<compile_context>
chip_gen: v7x
topology: tpu7x:2x2x1
jax: 0.10.0
libtpu: 0.0.40
codegen_flags: <defaults>
</compile_context>

<pallas_src>
import functools

import jax
import jax.numpy as jnp
from jax.experimental import pallas as pl
from jax.experimental.pallas import tpu as pltpu


def _ntm_head_kernel(n_layers, H, T, I, seq_width,
                     x_ref, hc_ref, w_ref, b_ref, y_ref, hc_out_ref):
    """x_ref: (T*B, I) f32, time-flattened input.
    hc_ref: (2*n_layers, B, H) f32; rows [0:n) = h0, rows [n:2n) = c0.
    w_ref:  (n_layers+2, R, C) bf16 weight slab:
              block 0        -> W_ih layer 0      rows [0:I)
              block 1        -> W_hh layer 0      rows [0:H)
              block 1+l      -> [W_ih; W_hh] l>0  rows [0:2H)
              block n+1      -> W_out             rows [0:H), cols [0:seq_width)
    b_ref:  (n_layers+1, 1, C) f32; row l = b_ih[l]+b_hh[l], row n = b_out.
    PyTorch gate order (i, f, g, o) along the 4H axis.
    """
    B = hc_ref.shape[1]
    G = 4 * H

    # ---- Load packed parameter slabs once (aligned from-zero slices). ------
    wih0 = w_ref[0, 0:I, 0:G]                                      # bf16 (I, 4H)
    whh0 = w_ref[1, 0:H, 0:G]                                      # bf16 (H, 4H)
    w_cat = [w_ref[1 + l, 0:2 * H, 0:G] for l in range(1, n_layers)]  # (2H, 4H)
    w_out = w_ref[n_layers + 1, 0:H, 0:seq_width]                  # bf16 (H, W)

    bias = [b_ref[l, :, 0:G] for l in range(n_layers)]             # f32 (1, 4H)
    b_out = b_ref[n_layers, :, 0:seq_width]                        # f32 (1, W)

    # ---- Layer-0 input projection + bias for ALL timesteps in ONE matmul. --
    x_all = x_ref[...].astype(jnp.bfloat16)                        # (T*B, I)
    xproj = (jnp.dot(x_all, wih0, preferred_element_type=jnp.float32)
             + bias[0])                                            # (T*B, 4H) f32

    # f32 state for accuracy / output; bf16 mirror for MXU operands.
    h = [hc_ref[l] for l in range(n_layers)]                       # f32 (B, H)
    c = [hc_ref[n_layers + l] for l in range(n_layers)]
    hb = [h[l].astype(jnp.bfloat16) for l in range(n_layers)]

    def gate_update(l, gates):
        # Two whole-tile transcendentals (EUP) instead of four per-gate ones;
        # i/f/g/o extraction is static lane slicing of one (B, 4H) tile.
        sig = jax.nn.sigmoid(gates)
        th = jnp.tanh(gates)
        i_g = sig[:, 0 * H:1 * H]
        f_g = sig[:, 1 * H:2 * H]
        g_g = th[:, 2 * H:3 * H]
        o_g = sig[:, 3 * H:4 * H]
        c[l] = f_g * c[l] + i_g * g_g
        h[l] = o_g * jnp.tanh(c[l])
        hb[l] = h[l].astype(jnp.bfloat16)

    # T and n_layers are small & static -> fully unrolled recurrence on-chip.
    for t in range(T):
        # Layer 0: bias already folded into xproj; one serial matmul (h@W_hh).
        gate_update(0, xproj[t * B:(t + 1) * B, :]
                    + jnp.dot(hb[0], whh0, preferred_element_type=jnp.float32))
        for l in range(1, n_layers):
            # Fused input+recurrent matmul: ONE MXU push per upper-layer cell.
            cat = jnp.concatenate([hb[l - 1], hb[l]], axis=-1)     # (B, 2H) bf16
            gate_update(l, jnp.dot(cat, w_cat[l - 1],
                                   preferred_element_type=jnp.float32)
                        + bias[l])
        if t == 0:
            # y only depends on t=0's top-layer output: compute & store it now
            # so it retires under the remaining recurrence steps.
            y = (jnp.dot(hb[n_layers - 1], w_out,
                         preferred_element_type=jnp.float32) + b_out)
            y_ref[...] = jax.nn.sigmoid(y)

    # ---- Single merged final-state output (one DMA instead of two). --------
    for l in range(n_layers):
        hc_out_ref[l] = h[l]
        hc_out_ref[n_layers + l] = c[l]


def pack_ntm_head_params(lstm_params, w_out, b_out):
    """One-time packing of parameters into two slabs (hoisted out of the
    per-call hot path): a bf16 weight slab and an f32 bias slab.

    lstm_params: list of (w_ih[(in,4H)], w_hh[(H,4H)], b_ih[(1,4H)],
    b_hh[(1,4H)]) per layer (f32, pre-transposed to (in, 4H) layout);
    w_out: (H, seq_width); b_out: (1, seq_width)."""
    n_layers = len(lstm_params)
    I = lstm_params[0][0].shape[0]
    H = lstm_params[0][1].shape[0]
    G = 4 * H
    seq_width = w_out.shape[1]
    C = max(G, seq_width)
    R = max(I, 2 * H)

    def pad_block(w):
        r, cc = w.shape
        return jnp.pad(w, ((0, R - r), (0, C - cc)))

    blocks = [pad_block(lstm_params[0][0]), pad_block(lstm_params[0][1])]
    for l in range(1, n_layers):
        w_ih, w_hh, _, _ = lstm_params[l]
        blocks.append(pad_block(jnp.concatenate([w_ih, w_hh], axis=0)))
    blocks.append(pad_block(w_out))
    w_slab = jnp.stack(blocks, axis=0).astype(jnp.bfloat16)   # (n+2, R, C)

    brows = [jnp.pad(b_ih + b_hh, ((0, 0), (0, C - G)))
             for (_, _, b_ih, b_hh) in lstm_params]            # pre-folded bias
    brows.append(jnp.pad(b_out, ((0, 0), (0, C - seq_width))))
    b_slab = jnp.stack(brows, axis=0).astype(jnp.float32)      # (n+1, 1, C)
    return w_slab, b_slab


def ntm_head_forward(x, hc, w_slab, b_slab, *, seq_width):
    """x: (T, B, I) f32; hc: (2*n_layers, B, H) f32 state carry
    (rows [0:n)=h, [n:2n)=c); w_slab/b_slab from pack_ntm_head_params.

    Returns (y=(B, seq_width), hc_fin=(2*n_layers, B, H))."""
    T, B, I = x.shape
    n2, _, H = hc.shape
    n_layers = n2 // 2

    # Time-flatten x (contiguous metadata reshape) so the kernel can do a
    # single layer-0 input projection over all timesteps.
    x2d = x.reshape(T * B, I)

    out_shapes = (
        jax.ShapeDtypeStruct((B, seq_width), jnp.float32),
        jax.ShapeDtypeStruct((2 * n_layers, B, H), jnp.float32),
    )

    kernel = functools.partial(_ntm_head_kernel, n_layers, H, T, I, seq_width)
    vmem = pltpu.MemorySpace.VMEM
    y, hc_fin = pl.pallas_call(
        kernel,
        out_shape=out_shapes,
        in_specs=[pl.BlockSpec(memory_space=vmem)] * 4,
        out_specs=(pl.BlockSpec(memory_space=vmem),) * 2,
    )(x2d, hc, w_slab, b_slab)
    return y, hc_fin


def _reference_forward(x, h0, c0, lstm_params, w_out, b_out):
    """Pure-JAX f32 reference (same math as torch.nn.LSTM + Linear + sigmoid)."""
    T = x.shape[0]
    n_layers, _, H = h0.shape
    h = [h0[l] for l in range(n_layers)]
    c = [c0[l] for l in range(n_layers)]
    y_t0 = None
    for t in range(T):
        inp = x[t]
        for l in range(n_layers):
            w_ih, w_hh, b_ih, b_hh = lstm_params[l]
            gates = inp @ w_ih + h[l] @ w_hh + b_ih + b_hh
            i_g = jax.nn.sigmoid(gates[:, 0 * H:1 * H])
            f_g = jax.nn.sigmoid(gates[:, 1 * H:2 * H])
            g_g = jnp.tanh(gates[:, 2 * H:3 * H])
            o_g = jax.nn.sigmoid(gates[:, 3 * H:4 * H])
            c[l] = f_g * c[l] + i_g * g_g
            h[l] = o_g * jnp.tanh(c[l])
            inp = h[l]
        if t == 0:
            y_t0 = inp
    y = jax.nn.sigmoid(y_t0 @ w_out + b_out)
    return y, jnp.stack(h, axis=0), jnp.stack(c, axis=0)


if __name__ == "__main__":
    # Hyperparameters implied by the module's __init__ (p.*), kept small.
    seq_width = 8          # p.seq_width -> LSTM input size = seq_width + 1 = 9
    hidden = 32            # p.ctrl.hidden_size
    n_layers = 2           # p.ctrl.n
    batch = 2              # p.batch_size
    seq_len = 8            # sequence length of the input x

    input_size = seq_width + 1

    key = jax.random.PRNGKey(0)
    keys = iter(jax.random.split(key, 4 + 4 * n_layers + 4))

    x = jax.random.normal(next(keys), (seq_len, batch, input_size), jnp.float32)
    h0 = jax.random.normal(next(keys), (n_layers, batch, hidden), jnp.float32)
    c0 = jax.random.normal(next(keys), (n_layers, batch, hidden), jnp.float32)

    scale = 0.1
    lstm_params = []
    for l in range(n_layers):
        in_l = input_size if l == 0 else hidden
        # Stored already transposed: (in, 4H), (H, 4H); biases as (1, 4H).
        w_ih = scale * jax.random.normal(next(keys), (in_l, 4 * hidden), jnp.float32)
        w_hh = scale * jax.random.normal(next(keys), (hidden, 4 * hidden), jnp.float32)
        b_ih = scale * jax.random.normal(next(keys), (1, 4 * hidden), jnp.float32)
        b_hh = scale * jax.random.normal(next(keys), (1, 4 * hidden), jnp.float32)
        lstm_params.append((w_ih, w_hh, b_ih, b_hh))

    w_out = scale * jax.random.normal(next(keys), (hidden, seq_width), jnp.float32)
    b_out = scale * jax.random.normal(next(keys), (1, seq_width), jnp.float32)

    # One-time parameter packing (hoisted out of the per-call hot path).
    w_slab, b_slab = pack_ntm_head_params(lstm_params, w_out, b_out)
    # Stateful (h, c) carry as a single stacked array; the kernel output
    # hc_fin can be fed straight back in on the next call.
    hc0 = jnp.concatenate([h0, c0], axis=0)            # (2*n, B, H)

    y, hc_fin = ntm_head_forward(x, hc0, w_slab, b_slab, seq_width=seq_width)
    jax.block_until_ready((y, hc_fin))

    y_ref, h_ref, c_ref = _reference_forward(x, h0, c0, lstm_params, w_out, b_out)
    h_fin = hc_fin[:n_layers]
    c_fin = hc_fin[n_layers:]
    assert y.shape == (batch, seq_width)
    assert hc_fin.shape == (2 * n_layers, batch, hidden)
    # Tolerances loosened vs. f32 reference because matmul operands (including
    # the recurrent state mirror) are bf16 with f32 accumulation.
    assert jnp.allclose(y, y_ref, atol=2e-2, rtol=2e-2)
    assert jnp.allclose(h_fin, h_ref, atol=5e-2, rtol=5e-2)
    assert jnp.allclose(c_fin, c_ref, atol=5e-2, rtol=5e-2)

    print("KERNEL_OK")
</pallas_src>

<mosaic_0001>
module attributes {stable_mosaic.version = 11 : i64} {
  func.func @_ntm_head_kernel(%arg0: memref<16x9xf32, #tpu.memory_space<vmem>>, %arg1: memref<4x2x32xf32, #tpu.memory_space<vmem>>, %arg2: memref<4x64x128xbf16, #tpu.memory_space<vmem>>, %arg3: memref<3x1x128xf32, #tpu.memory_space<vmem>>, %arg4: memref<2x8xf32, #tpu.memory_space<vmem>>, %arg5: memref<4x2x32xf32, #tpu.memory_space<vmem>>) attributes {dimension_semantics = [], scalar_prefetch = 0 : i64, scratch_operands = 0 : i64, tpu.core_type = #tpu.core_type<tc>} {
    %c0 = arith.constant 0 : index
    %c0_0 = arith.constant 0 : index
    %c0_1 = arith.constant 0 : index
    %0 = vector.load %arg2[%c0, %c0_0, %c0_1] : memref<4x64x128xbf16, #tpu.memory_space<vmem>>, vector<1x9x128xbf16>
    %1 = vector.shape_cast %0 : vector<1x9x128xbf16> to vector<9x128xbf16>
    %c1 = arith.constant 1 : index
    %c0_2 = arith.constant 0 : index
    %c0_3 = arith.constant 0 : index
    %2 = vector.load %arg2[%c1, %c0_2, %c0_3] : memref<4x64x128xbf16, #tpu.memory_space<vmem>>, vector<1x32x128xbf16>
    %3 = vector.shape_cast %2 : vector<1x32x128xbf16> to vector<32x128xbf16>
    %c2 = arith.constant 2 : index
    %c0_4 = arith.constant 0 : index
    %c0_5 = arith.constant 0 : index
    %4 = vector.load %arg2[%c2, %c0_4, %c0_5] : memref<4x64x128xbf16, #tpu.memory_space<vmem>>, vector<1x64x128xbf16>
    %5 = vector.shape_cast %4 : vector<1x64x128xbf16> to vector<64x128xbf16>
    %c3 = arith.constant 3 : index
    %c0_6 = arith.constant 0 : index
    %c0_7 = arith.constant 0 : index
    %6 = vector.load %arg2[%c3, %c0_6, %c0_7] : memref<4x64x128xbf16, #tpu.memory_space<vmem>>, vector<1x32x8xbf16>
    %7 = vector.shape_cast %6 : vector<1x32x8xbf16> to vector<32x8xbf16>
    %c0_8 = arith.constant 0 : index
    %c0_9 = arith.constant 0 : index
    %c0_10 = arith.constant 0 : index
    %8 = vector.load %arg3[%c0_8, %c0_9, %c0_10] : memref<3x1x128xf32, #tpu.memory_space<vmem>>, vector<1x1x128xf32>
    %9 = vector.shape_cast %8 : vector<1x1x128xf32> to vector<1x128xf32>
    %c1_11 = arith.constant 1 : index
    %c0_12 = arith.constant 0 : index
    %c0_13 = arith.constant 0 : index
    %10 = vector.load %arg3[%c1_11, %c0_12, %c0_13] : memref<3x1x128xf32, #tpu.memory_space<vmem>>, vector<1x1x128xf32>
    %11 = vector.shape_cast %10 : vector<1x1x128xf32> to vector<1x128xf32>
    %c2_14 = arith.constant 2 : index
    %c0_15 = arith.constant 0 : index
    %c0_16 = arith.constant 0 : index
    %12 = vector.load %arg3[%c2_14, %c0_15, %c0_16] : memref<3x1x128xf32, #tpu.memory_space<vmem>>, vector<1x1x8xf32>
    %13 = vector.shape_cast %12 : vector<1x1x8xf32> to vector<1x8xf32>
    %c0_17 = arith.constant 0 : index
    %c0_18 = arith.constant 0 : index
    %14 = vector.load %arg0[%c0_17, %c0_18] : memref<16x9xf32, #tpu.memory_space<vmem>>, vector<16x9xf32>
    %15 = arith.truncf %14 : vector<16x9xf32> to vector<16x9xbf16>
    %cst = arith.constant dense<0.000000e+00> : vector<16x128xf32>
    %16 = tpu.matmul %15, %1, %cst {dimension_numbers = #tpu.dot_dimension_numbers<[1], [0], [0], [1], [0, 0, 1, 1], [], []>} : vector<16x9xbf16>, vector<9x128xbf16>, vector<16x128xf32> -> vector<16x128xf32>
    %17 = vector.broadcast %9 : vector<1x128xf32> to vector<16x128xf32>
    %18 = arith.addf %16, %17 : vector<16x128xf32>
    %c0_19 = arith.constant 0 : index
    %c0_20 = arith.constant 0 : index
    %c0_21 = arith.constant 0 : index
    %19 = vector.load %arg1[%c0_19, %c0_20, %c0_21] : memref<4x2x32xf32, #tpu.memory_space<vmem>>, vector<1x2x32xf32>
    %20 = vector.shape_cast %19 : vector<1x2x32xf32> to vector<2x32xf32>
    %c1_22 = arith.constant 1 : index
    %c0_23 = arith.constant 0 : index
    %c0_24 = arith.constant 0 : index
    %21 = vector.load %arg1[%c1_22, %c0_23, %c0_24] : memref<4x2x32xf32, #tpu.memory_space<vmem>>, vector<1x2x32xf32>
    %22 = vector.shape_cast %21 : vector<1x2x32xf32> to vector<2x32xf32>
    %c2_25 = arith.constant 2 : index
    %c0_26 = arith.constant 0 : index
    %c0_27 = arith.constant 0 : index
    %23 = vector.load %arg1[%c2_25, %c0_26, %c0_27] : memref<4x2x32xf32, #tpu.memory_space<vmem>>, vector<1x2x32xf32>
    %24 = vector.shape_cast %23 : vector<1x2x32xf32> to vector<2x32xf32>
    %c3_28 = arith.constant 3 : index
    %c0_29 = arith.constant 0 : index
    %c0_30 = arith.constant 0 : index
    %25 = vector.load %arg1[%c3_28, %c0_29, %c0_30] : memref<4x2x32xf32, #tpu.memory_space<vmem>>, vector<1x2x32xf32>
    %26 = vector.shape_cast %25 : vector<1x2x32xf32> to vector<2x32xf32>
    %27 = arith.truncf %20 : vector<2x32xf32> to vector<2x32xbf16>
    %28 = arith.truncf %22 : vector<2x32xf32> to vector<2x32xbf16>
    %29 = vector.extract_strided_slice %18 {offsets = [0, 0], sizes = [2, 128], strides = [1, 1]} : vector<16x128xf32> to vector<2x128xf32>
    %cst_31 = arith.constant dense<0.000000e+00> : vector<2x128xf32>
    %30 = tpu.matmul %27, %3, %cst_31 {dimension_numbers = #tpu.dot_dimension_numbers<[1], [0], [0], [1], [0, 0, 1, 1], [], []>} : vector<2x32xbf16>, vector<32x128xbf16>, vector<2x128xf32> -> vector<2x128xf32>
    %31 = arith.addf %29, %30 : vector<2x128xf32>
    %32 = arith.negf %31 : vector<2x128xf32>
    %33 = math.exp %32 : vector<2x128xf32>
    %cst_32 = arith.constant 1.000000e+00 : f32
    %34 = vector.broadcast %cst_32 : f32 to vector<2x128xf32>
    %35 = arith.addf %34, %33 : vector<2x128xf32>
    %36 = arith.divf %34, %35 : vector<2x128xf32>
    %37 = math.tanh %31 : vector<2x128xf32>
    %38 = vector.extract_strided_slice %36 {offsets = [0, 0], sizes = [2, 32], strides = [1, 1]} : vector<2x128xf32> to vector<2x32xf32>
    %39 = vector.extract_strided_slice %36 {offsets = [0, 32], sizes = [2, 32], strides = [1, 1]} : vector<2x128xf32> to vector<2x32xf32>
    %40 = vector.extract_strided_slice %37 {offsets = [0, 64], sizes = [2, 32], strides = [1, 1]} : vector<2x128xf32> to vector<2x32xf32>
    %41 = vector.extract_strided_slice %36 {offsets = [0, 96], sizes = [2, 32], strides = [1, 1]} : vector<2x128xf32> to vector<2x32xf32>
    %42 = arith.mulf %39, %24 : vector<2x32xf32>
    %43 = arith.mulf %38, %40 : vector<2x32xf32>
    %44 = arith.addf %42, %43 : vector<2x32xf32>
    %45 = math.tanh %44 : vector<2x32xf32>
    %46 = arith.mulf %41, %45 : vector<2x32xf32>
    %47 = arith.truncf %46 : vector<2x32xf32> to vector<2x32xbf16>
    %48 = tpu.concatenate %47, %28 in 1 : vector<2x32xbf16>, vector<2x32xbf16> -> vector<2x64xbf16>
    %cst_33 = arith.constant dense<0.000000e+00> : vector<2x128xf32>
    %49 = tpu.matmul %48, %5, %cst_33 {dimension_numbers = #tpu.dot_dimension_numbers<[1], [0], [0], [1], [0, 0, 1, 1], [], []>} : vector<2x64xbf16>, vector<64x128xbf16>, vector<2x128xf32> -> vector<2x128xf32>
    %50 = vector.broadcast %11 : vector<1x128xf32> to vector<2x128xf32>
    %51 = arith.addf %49, %50 : vector<2x128xf32>
    %52 = arith.negf %51 : vector<2x128xf32>
    %53 = math.exp %52 : vector<2x128xf32>
    %cst_34 = arith.constant 1.000000e+00 : f32
    %54 = vector.broadcast %cst_34 : f32 to vector<2x128xf32>
    %55 = arith.addf %54, %53 : vector<2x128xf32>
    %56 = arith.divf %54, %55 : vector<2x128xf32>
    %57 = math.tanh %51 : vector<2x128xf32>
    %58 = vector.extract_strided_slice %56 {offsets = [0, 0], sizes = [2, 32], strides = [1, 1]} : vector<2x128xf32> to vector<2x32xf32>
    %59 = vector.extract_strided_slice %56 {offsets = [0, 32], sizes = [2, 32], strides = [1, 1]} : vector<2x128xf32> to vector<2x32xf32>
    %60 = vector.extract_strided_slice %57 {offsets = [0, 64], sizes = [2, 32], strides = [1, 1]} : vector<2x128xf32> to vector<2x32xf32>
    %61 = vector.extract_strided_slice %56 {offsets = [0, 96], sizes = [2, 32], strides = [1, 1]} : vector<2x128xf32> to vector<2x32xf32>
    %62 = arith.mulf %59, %26 : vector<2x32xf32>
    %63 = arith.mulf %58, %60 : vector<2x32xf32>
    %64 = arith.addf %62, %63 : vector<2x32xf32>
    %65 = math.tanh %64 : vector<2x32xf32>
    %66 = arith.mulf %61, %65 : vector<2x32xf32>
    %67 = arith.truncf %66 : vector<2x32xf32> to vector<2x32xbf16>
    %cst_35 = arith.constant dense<0.000000e+00> : vector<2x8xf32>
    %68 = tpu.matmul %67, %7, %cst_35 {dimension_numbers = #tpu.dot_dimension_numbers<[1], [0], [0], [1], [0, 0, 1, 1], [], []>} : vector<2x32xbf16>, vector<32x8xbf16>, vector<2x8xf32> -> vector<2x8xf32>
    %69 = vector.broadcast %13 : vector<1x8xf32> to vector<2x8xf32>
    %70 = arith.addf %68, %69 : vector<2x8xf32>
    %71 = arith.negf %70 : vector<2x8xf32>
    %72 = math.exp %71 : vector<2x8xf32>
    %cst_36 = arith.constant 1.000000e+00 : f32
    %73 = vector.broadcast %cst_36 : f32 to vector<2x8xf32>
    %74 = arith.addf %73, %72 : vector<2x8xf32>
    %75 = arith.divf %73, %74 : vector<2x8xf32>
    %c0_37 = arith.constant 0 : index
    %c0_38 = arith.constant 0 : index
    %76 = vector.load %arg4[%c0_37, %c0_38] : memref<2x8xf32, #tpu.memory_space<vmem>>, vector<2x8xf32>
    tpu.vector_store %arg4[%c0_37, %c0_38], %75 {strides = array<i32>} : memref<2x8xf32, #tpu.memory_space<vmem>>, vector<2x8xf32>,
    %77 = vector.extract_strided_slice %18 {offsets = [2, 0], sizes = [2, 128], strides = [1, 1]} : vector<16x128xf32> to vector<2x128xf32>
    %cst_39 = arith.constant dense<0.000000e+00> : vector<2x128xf32>
    %78 = tpu.matmul %47, %3, %cst_39 {dimension_numbers = #tpu.dot_dimension_numbers<[1], [0], [0], [1], [0, 0, 1, 1], [], []>} : vector<2x32xbf16>, vector<32x128xbf16>, vector<2x128xf32> -> vector<2x128xf32>
    %79 = arith.addf %77, %78 : vector<2x128xf32>
    %80 = arith.negf %79 : vector<2x128xf32>
    %81 = math.exp %80 : vector<2x128xf32>
    %cst_40 = arith.constant 1.000000e+00 : f32
    %82 = vector.broadcast %cst_40 : f32 to vector<2x128xf32>
    %83 = arith.addf %82, %81 : vector<2x128xf32>
    %84 = arith.divf %82, %83 : vector<2x128xf32>
    %85 = math.tanh %79 : vector<2x128xf32>
    %86 = vector.extract_strided_slice %84 {offsets = [0, 0], sizes = [2, 32], strides = [1, 1]} : vector<2x128xf32> to vector<2x32xf32>
    %87 = vector.extract_strided_slice %84 {offsets = [0, 32], sizes = [2, 32], strides = [1, 1]} : vector<2x128xf32> to vector<2x32xf32>
    %88 = vector.extract_strided_slice %85 {offsets = [0, 64], sizes = [2, 32], strides = [1, 1]} : vector<2x128xf32> to vector<2x32xf32>
    %89 = vector.extract_strided_slice %84 {offsets = [0, 96], sizes = [2, 32], strides = [1, 1]} : vector<2x128xf32> to vector<2x32xf32>
    %90 = arith.mulf %87, %44 : vector<2x32xf32>
    %91 = arith.mulf %86, %88 : vector<2x32xf32>
    %92 = arith.addf %90, %91 : vector<2x32xf32>
    %93 = math.tanh %92 : vector<2x32xf32>
    %94 = arith.mulf %89, %93 : vector<2x32xf32>
    %95 = arith.truncf %94 : vector<2x32xf32> to vector<2x32xbf16>
    %96 = tpu.concatenate %95, %67 in 1 : vector<2x32xbf16>, vector<2x32xbf16> -> vector<2x64xbf16>
    %cst_41 = arith.constant dense<0.000000e+00> : vector<2x128xf32>
    %97 = tpu.matmul %96, %5, %cst_41 {dimension_numbers = #tpu.dot_dimension_numbers<[1], [0], [0], [1], [0, 0, 1, 1], [], []>} : vector<2x64xbf16>, vector<64x128xbf16>, vector<2x128xf32> -> vector<2x128xf32>
    %98 = vector.broadcast %11 : vector<1x128xf32> to vector<2x128xf32>
    %99 = arith.addf %97, %98 : vector<2x128xf32>
    %100 = arith.negf %99 : vector<2x128xf32>
    %101 = math.exp %100 : vector<2x128xf32>
    %cst_42 = arith.constant 1.000000e+00 : f32
    %102 = vector.broadcast %cst_42 : f32 to vector<2x128xf32>
    %103 = arith.addf %102, %101 : vector<2x128xf32>
    %104 = arith.divf %102, %103 : vector<2x128xf32>
    %105 = math.tanh %99 : vector<2x128xf32>
    %106 = vector.extract_strided_slice %104 {offsets = [0, 0], sizes = [2, 32], strides = [1, 1]} : vector<2x128xf32> to vector<2x32xf32>
    %107 = vector.extract_strided_slice %104 {offsets = [0, 32], sizes = [2, 32], strides = [1, 1]} : vector<2x128xf32> to vector<2x32xf32>
    %108 = vector.extract_strided_slice %105 {offsets = [0, 64], sizes = [2, 32], strides = [1, 1]} : vector<2x128xf32> to vector<2x32xf32>
    %109 = vector.extract_strided_slice %104 {offsets = [0, 96], sizes = [2, 32], strides = [1, 1]} : vector<2x128xf32> to vector<2x32xf32>
    %110 = arith.mulf %107, %64 : vector<2x32xf32>
    %111 = arith.mulf %106, %108 : vector<2x32xf32>
    %112 = arith.addf %110, %111 : vector<2x32xf32>
    %113 = math.tanh %112 : vector<2x32xf32>
    %114 = arith.mulf %109, %113 : vector<2x32xf32>
    %115 = arith.truncf %114 : vector<2x32xf32> to vector<2x32xbf16>
    %116 = vector.extract_strided_slice %18 {offsets = [4, 0], sizes = [2, 128], strides = [1, 1]} : vector<16x128xf32> to vector<2x128xf32>
    %cst_43 = arith.constant dense<0.000000e+00> : vector<2x128xf32>
    %117 = tpu.matmul %95, %3, %cst_43 {dimension_numbers = #tpu.dot_dimension_numbers<[1], [0], [0], [1], [0, 0, 1, 1], [], []>} : vector<2x32xbf16>, vector<32x128xbf16>, vector<2x128xf32> -> vector<2x128xf32>
    %118 = arith.addf %116, %117 : vector<2x128xf32>
    %119 = arith.negf %118 : vector<2x128xf32>
    %120 = math.exp %119 : vector<2x128xf32>
    %cst_44 = arith.constant 1.000000e+00 : f32
    %121 = vector.broadcast %cst_44 : f32 to vector<2x128xf32>
    %122 = arith.addf %121, %120 : vector<2x128xf32>
    %123 = arith.divf %121, %122 : vector<2x128xf32>
    %124 = math.tanh %118 : vector<2x128xf32>
    %125 = vector.extract_strided_slice %123 {offsets = [0, 0], sizes = [2, 32], strides = [1, 1]} : vector<2x128xf32> to vector<2x32xf32>
    %126 = vector.extract_strided_slice %123 {offsets = [0, 32], sizes = [2, 32], strides = [1, 1]} : vector<2x128xf32> to vector<2x32xf32>
    %127 = vector.extract_strided_slice %124 {offsets = [0, 64], sizes = [2, 32], strides = [1, 1]} : vector<2x128xf32> to vector<2x32xf32>
    %128 = vector.extract_strided_slice %123 {offsets = [0, 96], sizes = [2, 32], strides = [1, 1]} : vector<2x128xf32> to vector<2x32xf32>
    %129 = arith.mulf %126, %92 : vector<2x32xf32>
    %130 = arith.mulf %125, %127 : vector<2x32xf32>
    %131 = arith.addf %129, %130 : vector<2x32xf32>
    %132 = math.tanh %131 : vector<2x32xf32>
    %133 = arith.mulf %128, %132 : vector<2x32xf32>
    %134 = arith.truncf %133 : vector<2x32xf32> to vector<2x32xbf16>
    %135 = tpu.concatenate %134, %115 in 1 : vector<2x32xbf16>, vector<2x32xbf16> -> vector<2x64xbf16>
    %cst_45 = arith.constant dense<0.000000e+00> : vector<2x128xf32>
    %136 = tpu.matmul %135, %5, %cst_45 {dimension_numbers = #tpu.dot_dimension_numbers<[1], [0], [0], [1], [0, 0, 1, 1], [], []>} : vector<2x64xbf16>, vector<64x128xbf16>, vector<2x128xf32> -> vector<2x128xf32>
    %137 = vector.broadcast %11 : vector<1x128xf32> to vector<2x128xf32>
    %138 = arith.addf %136, %137 : vector<2x128xf32>
    %139 = arith.negf %138 : vector<2x128xf32>
    %140 = math.exp %139 : vector<2x128xf32>
    %cst_46 = arith.constant 1.000000e+00 : f32
    %141 = vector.broadcast %cst_46 : f32 to vector<2x128xf32>
    %142 = arith.addf %141, %140 : vector<2x128xf32>
    %143 = arith.divf %141, %142 : vector<2x128xf32>
    %144 = math.tanh %138 : vector<2x128xf32>
    %145 = vector.extract_strided_slice %143 {offsets = [0, 0], sizes = [2, 32], strides = [1, 1]} : vector<2x128xf32> to vector<2x32xf32>
    %146 = vector.extract_strided_slice %143 {offsets = [0, 32], sizes = [2, 32], strides = [1, 1]} : vector<2x128xf32> to vector<2x32xf32>
    %147 = vector.extract_strided_slice %144 {offsets = [0, 64], sizes = [2, 32], strides = [1, 1]} : vector<2x128xf32> to vector<2x32xf32>
    %148 = vector.extract_strided_slice %143 {offsets = [0, 96], sizes = [2, 32], strides = [1, 1]} : vector<2x128xf32> to vector<2x32xf32>
    %149 = arith.mulf %146, %112 : vector<2x32xf32>
    %150 = arith.mulf %145, %147 : vector<2x32xf32>
    %151 = arith.addf %149, %150 : vector<2x32xf32>
    %152 = math.tanh %151 : vector<2x32xf32>
    %153 = arith.mulf %148, %152 : vector<2x32xf32>
    %154 = arith.truncf %153 : vector<2x32xf32> to vector<2x32xbf16>
    %155 = vector.extract_strided_slice %18 {offsets = [6, 0], sizes = [2, 128], strides = [1, 1]} : vector<16x128xf32> to vector<2x128xf32>
    %cst_47 = arith.constant dense<0.000000e+00> : vector<2x128xf32>
    %156 = tpu.matmul %134, %3, %cst_47 {dimension_numbers = #tpu.dot_dimension_numbers<[1], [0], [0], [1], [0, 0, 1, 1], [], []>} : vector<2x32xbf16>, vector<32x128xbf16>, vector<2x128xf32> -> vector<2x128xf32>
    %157 = arith.addf %155, %156 : vector<2x128xf32>
    %158 = arith.negf %157 : vector<2x128xf32>
    %159 = math.exp %158 : vector<2x128xf32>
    %cst_48 = arith.constant 1.000000e+00 : f32
    %160 = vector.broadcast %cst_48 : f32 to vector<2x128xf32>
    %161 = arith.addf %160, %159 : vector<2x128xf32>
    %162 = arith.divf %160, %161 : vector<2x128xf32>
    %163 = math.tanh %157 : vector<2x128xf32>
    %164 = vector.extract_strided_slice %162 {offsets = [0, 0], sizes = [2, 32], strides = [1, 1]} : vector<2x128xf32> to vector<2x32xf32>
    %165 = vector.extract_strided_slice %162 {offsets = [0, 32], sizes = [2, 32], strides = [1, 1]} : vector<2x128xf32> to vector<2x32xf32>
    %166 = vector.extract_strided_slice %163 {offsets = [0, 64], sizes = [2, 32], strides = [1, 1]} : vector<2x128xf32> to vector<2x32xf32>
    %167 = vector.extract_strided_slice %162 {offsets = [0, 96], sizes = [2, 32], strides = [1, 1]} : vector<2x128xf32> to vector<2x32xf32>
    %168 = arith.mulf %165, %131 : vector<2x32xf32>
    %169 = arith.mulf %164, %166 : vector<2x32xf32>
    %170 = arith.addf %168, %169 : vector<2x32xf32>
    %171 = math.tanh %170 : vector<2x32xf32>
    %172 = arith.mulf %167, %171 : vector<2x32xf32>
    %173 = arith.truncf %172 : vector<2x32xf32> to vector<2x32xbf16>
    %174 = tpu.concatenate %173, %154 in 1 : vector<2x32xbf16>, vector<2x32xbf16> -> vector<2x64xbf16>
    %cst_49 = arith.constant dense<0.000000e+00> : vector<2x128xf32>
    %175 = tpu.matmul %174, %5, %cst_49 {dimension_numbers = #tpu.dot_dimension_numbers<[1], [0], [0], [1], [0, 0, 1, 1], [], []>} : vector<2x64xbf16>, vector<64x128xbf16>, vector<2x128xf32> -> vector<2x128xf32>
    %176 = vector.broadcast %11 : vector<1x128xf32> to vector<2x128xf32>
    %177 = arith.addf %175, %176 : vector<2x128xf32>
    %178 = arith.negf %177 : vector<2x128xf32>
    %179 = math.exp %178 : vector<2x128xf32>
    %cst_50 = arith.constant 1.000000e+00 : f32
    %180 = vector.broadcast %cst_50 : f32 to vector<2x128xf32>
    %181 = arith.addf %180, %179 : vector<2x128xf32>
    %182 = arith.divf %180, %181 : vector<2x128xf32>
    %183 = math.tanh %177 : vector<2x128xf32>
    %184 = vector.extract_strided_slice %182 {offsets = [0, 0], sizes = [2, 32], strides = [1, 1]} : vector<2x128xf32> to vector<2x32xf32>
    %185 = vector.extract_strided_slice %182 {offsets = [0, 32], sizes = [2, 32], strides = [1, 1]} : vector<2x128xf32> to vector<2x32xf32>
    %186 = vector.extract_strided_slice %183 {offsets = [0, 64], sizes = [2, 32], strides = [1, 1]} : vector<2x128xf32> to vector<2x32xf32>
    %187 = vector.extract_strided_slice %182 {offsets = [0, 96], sizes = [2, 32], strides = [1, 1]} : vector<2x128xf32> to vector<2x32xf32>
    %188 = arith.mulf %185, %151 : vector<2x32xf32>
    %189 = arith.mulf %184, %186 : vector<2x32xf32>
    %190 = arith.addf %188, %189 : vector<2x32xf32>
    %191 = math.tanh %190 : vector<2x32xf32>
    %192 = arith.mulf %187, %191 : vector<2x32xf32>
    %193 = arith.truncf %192 : vector<2x32xf32> to vector<2x32xbf16>
    %194 = vector.extract_strided_slice %18 {offsets = [8, 0], sizes = [2, 128], strides = [1, 1]} : vector<16x128xf32> to vector<2x128xf32>
    %cst_51 = arith.constant dense<0.000000e+00> : vector<2x128xf32>
    %195 = tpu.matmul %173, %3, %cst_51 {dimension_numbers = #tpu.dot_dimension_numbers<[1], [0], [0], [1], [0, 0, 1, 1], [], []>} : vector<2x32xbf16>, vector<32x128xbf16>, vector<2x128xf32> -> vector<2x128xf32>
    %196 = arith.addf %194, %195 : vector<2x128xf32>
    %197 = arith.negf %196 : vector<2x128xf32>
    %198 = math.exp %197 : vector<2x128xf32>
    %cst_52 = arith.constant 1.000000e+00 : f32
    %199 = vector.broadcast %cst_52 : f32 to vector<2x128xf32>
    %200 = arith.addf %199, %198 : vector<2x128xf32>
    %201 = arith.divf %199, %200 : vector<2x128xf32>
    %202 = math.tanh %196 : vector<2x128xf32>
    %203 = vector.extract_strided_slice %201 {offsets = [0, 0], sizes = [2, 32], strides = [1, 1]} : vector<2x128xf32> to vector<2x32xf32>
    %204 = vector.extract_strided_slice %201 {offsets = [0, 32], sizes = [2, 32], strides = [1, 1]} : vector<2x128xf32> to vector<2x32xf32>
    %205 = vector.extract_strided_slice %202 {offsets = [0, 64], sizes = [2, 32], strides = [1, 1]} : vector<2x128xf32> to vector<2x32xf32>
    %206 = vector.extract_strided_slice %201 {offsets = [0, 96], sizes = [2, 32], strides = [1, 1]} : vector<2x128xf32> to vector<2x32xf32>
    %207 = arith.mulf %204, %170 : vector<2x32xf32>
    %208 = arith.mulf %203, %205 : vector<2x32xf32>
    %209 = arith.addf %207, %208 : vector<2x32xf32>
    %210 = math.tanh %209 : vector<2x32xf32>
    %211 = arith.mulf %206, %210 : vector<2x32xf32>
    %212 = arith.truncf %211 : vector<2x32xf32> to vector<2x32xbf16>
    %213 = tpu.concatenate %212, %193 in 1 : vector<2x32xbf16>, vector<2x32xbf16> -> vector<2x64xbf16>
    %cst_53 = arith.constant dense<0.000000e+00> : vector<2x128xf32>
    %214 = tpu.matmul %213, %5, %cst_53 {dimension_numbers = #tpu.dot_dimension_numbers<[1], [0], [0], [1], [0, 0, 1, 1], [], []>} : vector<2x64xbf16>, vector<64x128xbf16>, vector<2x128xf32> -> vector<2x128xf32>
    %215 = vector.broadcast %11 : vector<1x128xf32> to vector<2x128xf32>
    %216 = arith.addf %214, %215 : vector<2x128xf32>
    %217 = arith.negf %216 : vector<2x128xf32>
    %218 = math.exp %217 : vector<2x128xf32>
    %cst_54 = arith.constant 1.000000e+00 : f32
    %219 = vector.broadcast %cst_54 : f32 to vector<2x128xf32>
    %220 = arith.addf %219, %218 : vector<2x128xf32>
    %221 = arith.divf %219, %220 : vector<2x128xf32>
    %222 = math.tanh %216 : vector<2x128xf32>
    %223 = vector.extract_strided_slice %221 {offsets = [0, 0], sizes = [2, 32], strides = [1, 1]} : vector<2x128xf32> to vector<2x32xf32>
    %224 = vector.extract_strided_slice %221 {offsets = [0, 32], sizes = [2, 32], strides = [1, 1]} : vector<2x128xf32> to vector<2x32xf32>
    %225 = vector.extract_strided_slice %222 {offsets = [0, 64], sizes = [2, 32], strides = [1, 1]} : vector<2x128xf32> to vector<2x32xf32>
    %226 = vector.extract_strided_slice %221 {offsets = [0, 96], sizes = [2, 32], strides = [1, 1]} : vector<2x128xf32> to vector<2x32xf32>
    %227 = arith.mulf %224, %190 : vector<2x32xf32>
    %228 = arith.mulf %223, %225 : vector<2x32xf32>
    %229 = arith.addf %227, %228 : vector<2x32xf32>
    %230 = math.tanh %229 : vector<2x32xf32>
    %231 = arith.mulf %226, %230 : vector<2x32xf32>
    %232 = arith.truncf %231 : vector<2x32xf32> to vector<2x32xbf16>
    %233 = vector.extract_strided_slice %18 {offsets = [10, 0], sizes = [2, 128], strides = [1, 1]} : vector<16x128xf32> to vector<2x128xf32>
    %cst_55 = arith.constant dense<0.000000e+00> : vector<2x128xf32>
    %234 = tpu.matmul %212, %3, %cst_55 {dimension_numbers = #tpu.dot_dimension_numbers<[1], [0], [0], [1], [0, 0, 1, 1], [], []>} : vector<2x32xbf16>, vector<32x128xbf16>, vector<2x128xf32> -> vector<2x128xf32>
    %235 = arith.addf %233, %234 : vector<2x128xf32>
    %236 = arith.negf %235 : vector<2x128xf32>
    %237 = math.exp %236 : vector<2x128xf32>
    %cst_56 = arith.constant 1.000000e+00 : f32
    %238 = vector.broadcast %cst_56 : f32 to vector<2x128xf32>
    %239 = arith.addf %238, %237 : vector<2x128xf32>
    %240 = arith.divf %238, %239 : vector<2x128xf32>
    %241 = math.tanh %235 : vector<2x128xf32>
    %242 = vector.extract_strided_slice %240 {offsets = [0, 0], sizes = [2, 32], strides = [1, 1]} : vector<2x128xf32> to vector<2x32xf32>
    %243 = vector.extract_strided_slice %240 {offsets = [0, 32], sizes = [2, 32], strides = [1, 1]} : vector<2x128xf32> to vector<2x32xf32>
    %244 = vector.extract_strided_slice %241 {offsets = [0, 64], sizes = [2, 32], strides = [1, 1]} : vector<2x128xf32> to vector<2x32xf32>
    %245 = vector.extract_strided_slice %240 {offsets = [0, 96], sizes = [2, 32], strides = [1, 1]} : vector<2x128xf32> to vector<2x32xf32>
    %246 = arith.mulf %243, %209 : vector<2x32xf32>
    %247 = arith.mulf %242, %244 : vector<2x32xf32>
    %248 = arith.addf %246, %247 : vector<2x32xf32>
    %249 = math.tanh %248 : vector<2x32xf32>
    %250 = arith.mulf %245, %249 : vector<2x32xf32>
    %251 = arith.truncf %250 : vector<2x32xf32> to vector<2x32xbf16>
    %252 = tpu.concatenate %251, %232 in 1 : vector<2x32xbf16>, vector<2x32xbf16> -> vector<2x64xbf16>
    %cst_57 = arith.constant dense<0.000000e+00> : vector<2x128xf32>
    %253 = tpu.matmul %252, %5, %cst_57 {dimension_numbers = #tpu.dot_dimension_numbers<[1], [0], [0], [1], [0, 0, 1, 1], [], []>} : vector<2x64xbf16>, vector<64x128xbf16>, vector<2x128xf32> -> vector<2x128xf32>
    %254 = vector.broadcast %11 : vector<1x128xf32> to vector<2x128xf32>
    %255 = arith.addf %253, %254 : vector<2x128xf32>
    %256 = arith.negf %255 : vector<2x128xf32>
    %257 = math.exp %256 : vector<2x128xf32>
    %cst_58 = arith.constant 1.000000e+00 : f32
    %258 = vector.broadcast %cst_58 : f32 to vector<2x128xf32>
    %259 = arith.addf %258, %257 : vector<2x128xf32>
    %260 = arith.divf %258, %259 : vector<2x128xf32>
    %261 = math.tanh %255 : vector<2x128xf32>
    %262 = vector.extract_strided_slice %260 {offsets = [0, 0], sizes = [2, 32], strides = [1, 1]} : vector<2x128xf32> to vector<2x32xf32>
    %263 = vector.extract_strided_slice %260 {offsets = [0, 32], sizes = [2, 32], strides = [1, 1]} : vector<2x128xf32> to vector<2x32xf32>
    %264 = vector.extract_strided_slice %261 {offsets = [0, 64], sizes = [2, 32], strides = [1, 1]} : vector<2x128xf32> to vector<2x32xf32>
    %265 = vector.extract_strided_slice %260 {offsets = [0, 96], sizes = [2, 32], strides = [1, 1]} : vector<2x128xf32> to vector<2x32xf32>
    %266 = arith.mulf %263, %229 : vector<2x32xf32>
    %267 = arith.mulf %262, %264 : vector<2x32xf32>
    %268 = arith.addf %266, %267 : vector<2x32xf32>
    %269 = math.tanh %268 : vector<2x32xf32>
    %270 = arith.mulf %265, %269 : vector<2x32xf32>
    %271 = arith.truncf %270 : vector<2x32xf32> to vector<2x32xbf16>
    %272 = vector.extract_strided_slice %18 {offsets = [12, 0], sizes = [2, 128], strides = [1, 1]} : vector<16x128xf32> to vector<2x128xf32>
    %cst_59 = arith.constant dense<0.000000e+00> : vector<2x128xf32>
    %273 = tpu.matmul %251, %3, %cst_59 {dimension_numbers = #tpu.dot_dimension_numbers<[1], [0], [0], [1], [0, 0, 1, 1], [], []>} : vector<2x32xbf16>, vector<32x128xbf16>, vector<2x128xf32> -> vector<2x128xf32>
    %274 = arith.addf %272, %273 : vector<2x128xf32>
    %275 = arith.negf %274 : vector<2x128xf32>
    %276 = math.exp %275 : vector<2x128xf32>
    %cst_60 = arith.constant 1.000000e+00 : f32
    %277 = vector.broadcast %cst_60 : f32 to vector<2x128xf32>
    %278 = arith.addf %277, %276 : vector<2x128xf32>
    %279 = arith.divf %277, %278 : vector<2x128xf32>
    %280 = math.tanh %274 : vector<2x128xf32>
    %281 = vector.extract_strided_slice %279 {offsets = [0, 0], sizes = [2, 32], strides = [1, 1]} : vector<2x128xf32> to vector<2x32xf32>
    %282 = vector.extract_strided_slice %279 {offsets = [0, 32], sizes = [2, 32], strides = [1, 1]} : vector<2x128xf32> to vector<2x32xf32>
    %283 = vector.extract_strided_slice %280 {offsets = [0, 64], sizes = [2, 32], strides = [1, 1]} : vector<2x128xf32> to vector<2x32xf32>
    %284 = vector.extract_strided_slice %279 {offsets = [0, 96], sizes = [2, 32], strides = [1, 1]} : vector<2x128xf32> to vector<2x32xf32>
    %285 = arith.mulf %282, %248 : vector<2x32xf32>
    %286 = arith.mulf %281, %283 : vector<2x32xf32>
    %287 = arith.addf %285, %286 : vector<2x32xf32>
    %288 = math.tanh %287 : vector<2x32xf32>
    %289 = arith.mulf %284, %288 : vector<2x32xf32>
    %290 = arith.truncf %289 : vector<2x32xf32> to vector<2x32xbf16>
    %291 = tpu.concatenate %290, %271 in 1 : vector<2x32xbf16>, vector<2x32xbf16> -> vector<2x64xbf16>
    %cst_61 = arith.constant dense<0.000000e+00> : vector<2x128xf32>
    %292 = tpu.matmul %291, %5, %cst_61 {dimension_numbers = #tpu.dot_dimension_numbers<[1], [0], [0], [1], [0, 0, 1, 1], [], []>} : vector<2x64xbf16>, vector<64x128xbf16>, vector<2x128xf32> -> vector<2x128xf32>
    %293 = vector.broadcast %11 : vector<1x128xf32> to vector<2x128xf32>
    %294 = arith.addf %292, %293 : vector<2x128xf32>
    %295 = arith.negf %294 : vector<2x128xf32>
    %296 = math.exp %295 : vector<2x128xf32>
    %cst_62 = arith.constant 1.000000e+00 : f32
    %297 = vector.broadcast %cst_62 : f32 to vector<2x128xf32>
    %298 = arith.addf %297, %296 : vector<2x128xf32>
    %299 = arith.divf %297, %298 : vector<2x128xf32>
    %300 = math.tanh %294 : vector<2x128xf32>
    %301 = vector.extract_strided_slice %299 {offsets = [0, 0], sizes = [2, 32], strides = [1, 1]} : vector<2x128xf32> to vector<2x32xf32>
    %302 = vector.extract_strided_slice %299 {offsets = [0, 32], sizes = [2, 32], strides = [1, 1]} : vector<2x128xf32> to vector<2x32xf32>
    %303 = vector.extract_strided_slice %300 {offsets = [0, 64], sizes = [2, 32], strides = [1, 1]} : vector<2x128xf32> to vector<2x32xf32>
    %304 = vector.extract_strided_slice %299 {offsets = [0, 96], sizes = [2, 32], strides = [1, 1]} : vector<2x128xf32> to vector<2x32xf32>
    %305 = arith.mulf %302, %268 : vector<2x32xf32>
    %306 = arith.mulf %301, %303 : vector<2x32xf32>
    %307 = arith.addf %305, %306 : vector<2x32xf32>
    %308 = math.tanh %307 : vector<2x32xf32>
    %309 = arith.mulf %304, %308 : vector<2x32xf32>
    %310 = arith.truncf %309 : vector<2x32xf32> to vector<2x32xbf16>
    %311 = vector.extract_strided_slice %18 {offsets = [14, 0], sizes = [2, 128], strides = [1, 1]} : vector<16x128xf32> to vector<2x128xf32>
    %cst_63 = arith.constant dense<0.000000e+00> : vector<2x128xf32>
    %312 = tpu.matmul %290, %3, %cst_63 {dimension_numbers = #tpu.dot_dimension_numbers<[1], [0], [0], [1], [0, 0, 1, 1], [], []>} : vector<2x32xbf16>, vector<32x128xbf16>, vector<2x128xf32> -> vector<2x128xf32>
    %313 = arith.addf %311, %312 : vector<2x128xf32>
    %314 = arith.negf %313 : vector<2x128xf32>
    %315 = math.exp %314 : vector<2x128xf32>
    %cst_64 = arith.constant 1.000000e+00 : f32
    %316 = vector.broadcast %cst_64 : f32 to vector<2x128xf32>
    %317 = arith.addf %316, %315 : vector<2x128xf32>
    %318 = arith.divf %316, %317 : vector<2x128xf32>
    %319 = math.tanh %313 : vector<2x128xf32>
    %320 = vector.extract_strided_slice %318 {offsets = [0, 0], sizes = [2, 32], strides = [1, 1]} : vector<2x128xf32> to vector<2x32xf32>
    %321 = vector.extract_strided_slice %318 {offsets = [0, 32], sizes = [2, 32], strides = [1, 1]} : vector<2x128xf32> to vector<2x32xf32>
    %322 = vector.extract_strided_slice %319 {offsets = [0, 64], sizes = [2, 32], strides = [1, 1]} : vector<2x128xf32> to vector<2x32xf32>
    %323 = vector.extract_strided_slice %318 {offsets = [0, 96], sizes = [2, 32], strides = [1, 1]} : vector<2x128xf32> to vector<2x32xf32>
    %324 = arith.mulf %321, %287 : vector<2x32xf32>
    %325 = arith.mulf %320, %322 : vector<2x32xf32>
    %326 = arith.addf %324, %325 : vector<2x32xf32>
    %327 = math.tanh %326 : vector<2x32xf32>
    %328 = arith.mulf %323, %327 : vector<2x32xf32>
    %329 = arith.truncf %328 : vector<2x32xf32> to vector<2x32xbf16>
    %330 = tpu.concatenate %329, %310 in 1 : vector<2x32xbf16>, vector<2x32xbf16> -> vector<2x64xbf16>
    %cst_65 = arith.constant dense<0.000000e+00> : vector<2x128xf32>
    %331 = tpu.matmul %330, %5, %cst_65 {dimension_numbers = #tpu.dot_dimension_numbers<[1], [0], [0], [1], [0, 0, 1, 1], [], []>} : vector<2x64xbf16>, vector<64x128xbf16>, vector<2x128xf32> -> vector<2x128xf32>
    %332 = vector.broadcast %11 : vector<1x128xf32> to vector<2x128xf32>
    %333 = arith.addf %331, %332 : vector<2x128xf32>
    %334 = arith.negf %333 : vector<2x128xf32>
    %335 = math.exp %334 : vector<2x128xf32>
    %cst_66 = arith.constant 1.000000e+00 : f32
    %336 = vector.broadcast %cst_66 : f32 to vector<2x128xf32>
    %337 = arith.addf %336, %335 : vector<2x128xf32>
    %338 = arith.divf %336, %337 : vector<2x128xf32>
    %339 = math.tanh %333 : vector<2x128xf32>
    %340 = vector.extract_strided_slice %338 {offsets = [0, 0], sizes = [2, 32], strides = [1, 1]} : vector<2x128xf32> to vector<2x32xf32>
    %341 = vector.extract_strided_slice %338 {offsets = [0, 32], sizes = [2, 32], strides = [1, 1]} : vector<2x128xf32> to vector<2x32xf32>
    %342 = vector.extract_strided_slice %339 {offsets = [0, 64], sizes = [2, 32], strides = [1, 1]} : vector<2x128xf32> to vector<2x32xf32>
    %343 = vector.extract_strided_slice %338 {offsets = [0, 96], sizes = [2, 32], strides = [1, 1]} : vector<2x128xf32> to vector<2x32xf32>
    %344 = arith.mulf %341, %307 : vector<2x32xf32>
    %345 = arith.mulf %340, %342 : vector<2x32xf32>
    %346 = arith.addf %344, %345 : vector<2x32xf32>
    %347 = math.tanh %346 : vector<2x32xf32>
    %348 = arith.mulf %343, %347 : vector<2x32xf32>
    %c0_67 = arith.constant 0 : index
    %c0_68 = arith.constant 0 : index
    %c0_69 = arith.constant 0 : index
    %349 = vector.load %arg5[%c0_67, %c0_68, %c0_69] : memref<4x2x32xf32, #tpu.memory_space<vmem>>, vector<1x2x32xf32>
    %350 = vector.shape_cast %349 : vector<1x2x32xf32> to vector<2x32xf32>
    %351 = vector.shape_cast %328 : vector<2x32xf32> to vector<1x2x32xf32>
    tpu.vector_store %arg5[%c0_67, %c0_68, %c0_69], %351 {strides = array<i32>} : memref<4x2x32xf32, #tpu.memory_space<vmem>>, vector<1x2x32xf32>,
    %c2_70 = arith.constant 2 : index
    %c0_71 = arith.constant 0 : index
    %c0_72 = arith.constant 0 : index
    %352 = vector.load %arg5[%c2_70, %c0_71, %c0_72] : memref<4x2x32xf32, #tpu.memory_space<vmem>>, vector<1x2x32xf32>
    %353 = vector.shape_cast %352 : vector<1x2x32xf32> to vector<2x32xf32>
    %354 = vector.shape_cast %326 : vector<2x32xf32> to vector<1x2x32xf32>
    tpu.vector_store %arg5[%c2_70, %c0_71, %c0_72], %354 {strides = array<i32>} : memref<4x2x32xf32, #tpu.memory_space<vmem>>, vector<1x2x32xf32>,
    %c1_73 = arith.constant 1 : index
    %c0_74 = arith.constant 0 : index
    %c0_75 = arith.constant 0 : index
    %355 = vector.load %arg5[%c1_73, %c0_74, %c0_75] : memref<4x2x32xf32, #tpu.memory_space<vmem>>, vector<1x2x32xf32>
    %356 = vector.shape_cast %355 : vector<1x2x32xf32> to vector<2x32xf32>
    %357 = vector.shape_cast %348 : vector<2x32xf32> to vector<1x2x32xf32>
    tpu.vector_store %arg5[%c1_73, %c0_74, %c0_75], %357 {strides = array<i32>} : memref<4x2x32xf32, #tpu.memory_space<vmem>>, vector<1x2x32xf32>,
    %c3_76 = arith.constant 3 : index
    %c0_77 = arith.constant 0 : index
    %c0_78 = arith.constant 0 : index
    %358 = vector.load %arg5[%c3_76, %c0_77, %c0_78] : memref<4x2x32xf32, #tpu.memory_space<vmem>>, vector<1x2x32xf32>
    %359 = vector.shape_cast %358 : vector<1x2x32xf32> to vector<2x32xf32>
    %360 = vector.shape_cast %346 : vector<2x32xf32> to vector<1x2x32xf32>
    tpu.vector_store %arg5[%c3_76, %c0_77, %c0_78], %360 {strides = array<i32>} : memref<4x2x32xf32, #tpu.memory_space<vmem>>, vector<1x2x32xf32>,
    return
  }
}

</mosaic_0001>

<bundles_post_ra>
// kernel: tpu_custom_call.1
= control target key start
LH: loop header
LB: loop body
LE: loop exit
PB: predicated region body
PF: predicated region fallthrough
CT: control target
= control target key end

     0   :  { %11 = vsyncpa [#allocation3], 0  ;;  %s2592_s0 = inlined_call_operand.hbm [shape: f32[16,9], index: 0, kind: input, shape index: {}]   ;;  %s2593_s1 = inlined_call_operand.hbm [shape: f32[4,2,32], index: 1, kind: input, shape index: {}]   ;;  %s2594_s2 = inlined_call_operand.hbm [shape: bf16[4,64,128], index: 2, kind: input, shape index: {}]   ;;  %s2595_s3 = inlined_call_operand.vmem [shape: f32[3,1,128], index: 3, kind: input, shape index: {}]   ;;  %s2596_s4 = inlined_call_operand.hbm [shape: f32[2,8], index: 4, kind: output, shape index: {0}]   ;;  %s2597_s5 = inlined_call_operand.hbm [shape: f32[4,2,32], index: 5, kind: output, shape index: {1}]  }
   0x1   :  { %12 = vsyncpa [#allocation6], 0 }
   0x2   :  { %13 = vsyncpa [#allocation4], 0 }
   0x3   :  { %14 = vsyncpa [#allocation10], 0  ;;  %s2150_s18 = smov [#allocation5]   ;;  %s2032_s22 = scalar_lea.hbm %s2593_s1, 128 }
   0x4   :  { %s32_s19 = sshll.u32 %s2150_s18, 4  ;;  %p2033_p0 = scmp.ne.s32.totalorder %s2593_s1, %s2032_s22  ;;  %s33_s19 = int_to_ptr.vmem [resolvable:$true] %s32_s19 }
   0x5   :  { %p2036_p1 = scmp.lt.u32.totalorder %s2032_s22, %s2593_s1 }
   0x7   :  { %p2038_p2 = pnand %p2036_p1, %p2033_p0 }
   0x9   :  { %2041 = shalt.err (!%p2038_p2)
}
   0xa   :  { %s2042_s27 = scalar_lea.vmem %s33_s19, 128  ;;  %p2047_p4 = scmp.lt.s32.totalorder %s33_s19, %s33_s19 }
   0xb   :  { %p2043_p3 = scmp.ne.s32.totalorder %s33_s19, %s2042_s27  ;;  %p2048_p5 = scmp.lt.s32.totalorder %s2042_s27, %s2042_s27 }
   0xd   :  { %p2049_p6 = por %p2048_p5, %p2047_p4 }
   0xf   :  { %p2050_p7 = pnand %p2049_p6, %p2043_p3 }
  0x11   :  { %2053 = shalt.err (!%p2050_p7)
}
  0x12   :  { %s2151_s28 = smov 32   ;;  %s2152_s29 = smov 2  }
  0x13   :  { %38 = dma.hbm_to_vmem [thread:$0]  %s2593_s1, 128, %s33_s19, [#allocation6], %s2151_s28, %s2151_s28, %s2152_s29  }
  0x14   :  { %s2153_s7 = smov [#allocation2]   ;;  %s2054_s11 = scalar_lea.hbm %s2592_s0, 256 }
  0x15   :  { %s20_s8 = sshll.u32 %s2153_s7, 4  ;;  %p2055_p8 = scmp.ne.s32.totalorder %s2592_s0, %s2054_s11  ;;  %s21_s8 = int_to_ptr.vmem [resolvable:$true] %s20_s8 }
  0x16   :  { %p2058_p9 = scmp.lt.u32.totalorder %s2054_s11, %s2592_s0 }
  0x18   :  { %p2060_p10 = pnand %p2058_p9, %p2055_p8 }
  0x1a   :  { %2063 = shalt.err (!%p2060_p10)
}
  0x1b   :  { %s2064_s16 = scalar_lea.vmem %s21_s8, 256  ;;  %p2069_p12 = scmp.lt.s32.totalorder %s21_s8, %s21_s8 }
  0x1c   :  { %p2065_p11 = scmp.ne.s32.totalorder %s21_s8, %s2064_s16  ;;  %p2070_p13 = scmp.lt.s32.totalorder %s2064_s16, %s2064_s16 }
  0x1e   :  { %p2071_p0 = por %p2070_p13, %p2069_p12 }
  0x20   :  { %p2072_p1 = pnand %p2071_p0, %p2065_p11 }
  0x22   :  { %2075 = shalt.err (!%p2072_p1)
}
  0x23   :  { %s2154_s1 = smov 128   ;;  %s2155_s17 = smov 8  }
  0x24   :  { %26 = dma.hbm_to_vmem [thread:$0]  %s2592_s0, 256, %s21_s8, [#allocation3], %s2154_s1, %s2154_s1, %s2155_s17  }
  0x25   :  { %s2156_s20 = smov [#allocation7]   ;;  %s2076_s24 = scalar_lea.hbm %s2594_s2, 2048 }
  0x26   :  { %s44_s21 = sshll.u32 %s2156_s20, 4  ;;  %p2077_p2 = scmp.ne.s32.totalorder %s2594_s2, %s2076_s24  ;;  %s45_s21 = int_to_ptr.vmem [resolvable:$true] %s44_s21 }
  0x27   :  { %p2080_p3 = scmp.lt.u32.totalorder %s2076_s24, %s2594_s2 }
  0x29   :  { %p2082_p4 = pnand %p2080_p3, %p2077_p2 }
  0x2b   :  { %2085 = shalt.err (!%p2082_p4)
}
  0x2c   :  { %s2086_s6 = scalar_lea.vmem %s45_s21, 2048  ;;  %p2091_p6 = scmp.lt.s32.totalorder %s45_s21, %s45_s21 }
  0x2d   :  { %p2087_p5 = scmp.ne.s32.totalorder %s45_s21, %s2086_s6  ;;  %p2092_p7 = scmp.lt.s32.totalorder %s2086_s6, %s2086_s6 }
  0x2f   :  { %p2093_p8 = por %p2092_p7, %p2091_p6 }
  0x31   :  { %p2094_p9 = pnand %p2093_p8, %p2087_p5 }
  0x33   :  { %2097 = shalt.err (!%p2094_p9)
}
  0x34   :  { %s2157_s0 = smov 64   ;;  %s2158_s7 = smov 4  }
  0x35   :  { %50 = dma.hbm_to_vmem [thread:$0]  %s2594_s2, 2048, %s45_s21, [#allocation6], %s2157_s0, %s2157_s0, %s2158_s7  }
  0x36   :  { %2142 = dma.done.wait [#allocation3], 256  }
  0x37   :  { %2143 = vsyncadd [#allocation3], 4294967040 }
  0x38   :  { %2144 = dma.done.wait [#allocation6], 2176  }
  0x39   :  { %2145 = vsyncadd [#allocation6], 4294965120  ;;  %vm107_vm0 = vcmask 1043456   ;;  %v2159_v0 = vmov 0.0   ;;  %vm2160_vm1 = vmmov 0   ;;  %vm108_vm2 = vcmask 1044480  }
  0x3a   :  { %1697 = vmatprep.subr.bf16.mxu1 %v2159_v0  ;;  %1711 = vmatprep.subr.bf16.mxu0 %v2159_v0  ;;  %v2161_v1 = vmov 65535   ;;  %v1886_v4 = vld [vmem:[#allocation7] sm:$0x1f]   ;;  %v89_v5 = vld [vmem:[#allocation2] sm:$0xff]  ;;  %v90_v6 = vld [vmem:[#allocation2 + $0x8] sm:$0xff]  ;;  %vm103_vm3 = vcmask 72704  }
  0x3b   :  { %1699 = vmatprep.mubr.msk.bf16.mxu1 %vm2160_vm1, %v2159_v0  ;;  %1719 = vmatprep.mubr.msk.bf16.mxu0 %vm2160_vm1, %v2159_v0  ;;  %v109_v2 = vsel %vm107_vm0, 4294967295, %v2161_v1  ;;  %v91_v8 = vpack.c.bf16 %v90_v6, %v89_v5  ;;  %v2242_v9 = vld [vmem:[#allocation7 + $0x20] sm:$0xff]   ;;  %v2246_v10 = vld [vmem:[#allocation7 + $0x28] sm:$0xff]   ;;  %v155_v11 = vld [vmem:[#allocation5] sm:$0x3]  ;;  %vm176_vm4 = vcmask 261120  }
  0x3c   :  { %v110_v3 = vsel %vm108_vm2, %v109_v2, 0  ;;  %v162_v12 = vpack.c.bf16 %v155_v11, %v155_v11  ;;  %v1581_v15 = vld [vmem:[%s2595_s3] ss:$0 sm:$0xff]  ;;  %v159_v26 = vld [vmem:[#allocation5 + $0x4] sm:$0x3]  ;;  %v2270_v37 = vld [vmem:[#allocation7 + $0x40] sm:$0xff]  }
  0x3d   :  { %v112_v7 = vand.u32 %v1886_v4, %v110_v3  ;;  %1712 = vmatpush3.bf16.msra.mxu0 %v2270_v37  ;;  %v2273_v38 = vld [vmem:[#allocation7 + $0x48] sm:$0xff]   ;;  %v157_v39 = vld [vmem:[#allocation5 + $0x2] sm:$0x3]  ;;  %v2277_v40 = vld [vmem:[#allocation7 + $0x50] sm:$0xff]   ;;  %vm289_vm5 = vcmask 523264   ;;  %vm431_vm6 = vcmask 58368  }
  0x3e   :  { %1713 = vmatprep.subr.bf16.mxu0 %v2159_v0  ;;  %v163_v42 = vpack.c.bf16 %v157_v39, %v157_v39  ;;  %v2282_v43 = vld [vmem:[#allocation7 + $0x58] sm:$0xff]   ;;  %v2305_v51 = vld [vmem:[%s2595_s3 + $0x1] ss:$0 sm:$0xff]  ;;  %v1893_v5 = vld [vmem:[#allocation7 + $0x60] sm:$0xff]   ;;  %vm1526_vm7 = vcmask 261126   ;;  %s2163_s1 = smov [#allocation8]  }
  0x3f   :  { %1698 = vmatpush3.bf16.msra.mxu1 %v112_v7  ;;  %v161_v44 = vld [vmem:[#allocation5 + $0x6] sm:$0x3]  ;;  %v1894_v6 = vld [vmem:[#allocation7 + $0x68] sm:$0xff]   ;;  %s1553_s17 = sshll.u32 %s2163_s1, 4  ;;  %s1554_s17 = int_to_ptr.vmem [resolvable:$true] %s1553_s17 }
  0x40   :  { %1703 = vmatprep.subr.bf16.mxu1 %v2159_v0  ;;  %s2098_s18 = scalar_lea.vmem %s1554_s17, 32  ;;  %p2103_p11 = scmp.lt.s32.totalorder %s1554_s17, %s1554_s17 }
  0x41   :  { %1714 = vmatpush3.bf16.msra.mxu0 %v2273_v38  ;;  %p2099_p10 = scmp.ne.s32.totalorder %s1554_s17, %s2098_s18  ;;  %p2104_p12 = scmp.lt.s32.totalorder %s2098_s18, %s2098_s18 }
  0x42   :  { %1700 = vmatmul.mubr.msk.bf16.vlgmr.msra.gmra.mrb[0].mxu1 %vm103_vm3, %v91_v8  ;;  %1715 = vmatprep.subr.bf16.mxu0 %v2159_v0 }
  0x43   :  { %1704 = vmatpush3.bf16.msra.mxu1 %v2242_v9  ;;  %1707 = vmatprep.mubr.msk.bf16.mxu1 %vm2160_vm1, %v2159_v0  ;;  %p2105_p13 = por %p2104_p12, %p2103_p11 }
  0x44   :  { %1705 = vmatprep.subr.bf16.mxu1 %v2159_v0 }
  0x45   :  { %1716 = vmatpush3.bf16.msra.mxu0 %v2277_v40  ;;  %p2106_p0 = pnand %p2105_p13, %p2099_p10 }
  0x46   :  { %1717 = vmatprep.subr.bf16.mxu0 %v2159_v0 }
  0x47   :  { %1706 = vmatpush3.bf16.msra.mxu1 %v2246_v10 }
  0x48   :  { %1723 = vmatprep.subr.bf16.mxu1 %v2159_v0 }
  0x49   :  { %1718 = vmatpush3.bf16.msra.mxu0 %v2282_v43 }
  0x4a   :  { %1708 = vmatmul.mubr.msk.bf16.vlgmr.msra.gmra.mrb[4].mxu1 %vm176_vm4, %v162_v12  ;;  %1739 = vmatprep.subr.bf16.mxu0 %v2159_v0 }
  0x4b   :  { %1727 = vmatprep.mubr.msk.bf16.mxu1 %vm2160_vm1, %v2159_v0  ;;  %1724 = vmatpush3.bf16.msra.mxu1 %v1893_v5 }
  0x4c   :  { %1725 = vmatprep.subr.bf16.mxu1 %v2159_v0 }
  0x4f   :  { %1726 = vmatpush3.bf16.msra.mxu1 %v1894_v6 }
  0x50   :  { %1731 = vmatprep.subr.bf16.mxu1 %v2159_v0 }
 0x115   :  { %v148_v13 = vpop.f32.mrb[0].mxu1 }
 0x116   :  { %v1701_v14 = vpop.f32.mrb[1].mxu1  ;;  %v2261_v19 = vadd.f32 %v1581_v15, %v148_v13 }
 0x117   :  { %v151_v16 = vpop.f32.mrb[2].mxu1  ;;  %v1595_v14 = vld [vmem:[%s2595_s3 + $0x2] ss:$0 sm:$0xff] }
 0x118   :  { %v2259_v17 = vadd.f32 %v1581_v15, %v151_v16  ;;  %v1702_v18 = vpop.f32.mrb[3].mxu1 }
 0x11d   :  { %v214_v20 = vpop.f32.mrb[4].mxu1 }
 0x11e   :  { %v220_v21 = vadd.f32 %v214_v20, %v2261_v19  ;;  %v1709_v22 = vpop.f32.mrb[5].mxu1 }
 0x11f   :  { %v217_v23 = vpop.f32.mrb[6].mxu1 }
 0x120   :  { %v1710_v24 = vpop.f32.mrb[7].mxu1  ;;  %1895 = vtanh.f32 %v220_v21  ;;  %v1587_v27 = vmul.f32 -1.442695, %v220_v21 }
 0x122   :  { %1897 = vpow2.f32 %v1587_v27 }
 0x12a   :  { %v1896_v25 = vpop.eup %1895 }
 0x12b   :  { %234 = vrot.lane.b32.xlu0 %v1896_v25, %s2157_s0 }
 0x12c   :  { %v1898_v28 = vpop.eup %1897 }
 0x12d   :  { %v224_v29 = vadd.f32 1.0, %v1898_v28 }
 0x12f   :  { %229 = vrot.lane.b32.xlu0 %v159_v26, %s2151_s28  ;;  %1899 = vrcp.f32 %v224_v29 }
 0x139   :  { %v1900_v30 = vpop.eup %1899 }
 0x19d   :  { %v235_v31 = vpop.permute.xlu0 %234 }
 0x19e   :  { %v237_v32 = vmul.f32 %v1900_v30, %v235_v31 }
 0x1a0   :  { %239 = vrot.lane.b32.xlu1 %v237_v32, %s2151_s28 }
 0x1a1   :  { %v230_v33 = vpop.permute.xlu0 %229 }
 0x1a2   :  { %v232_v34 = vmul.f32 %v1900_v30, %v230_v33 }
 0x212   :  { %v240_v35 = vpop.permute.xlu1 %239 }
 0x213   :  { %v2267_v36 = vadd.f32 %v240_v35, %v232_v34 }
 0x215   :  { %1901 = vtanh.f32 %v2267_v36 }
 0x21f   :  { %v1902_v41 = vpop.eup %1901 }
 0x220   :  { %245 = vrot.lane.b32.xlu1 %v1902_v41, %s2157_s0 }
 0x224   :  { %254 = vrot.lane.b32.xlu1 %v163_v42, %s2151_s28 }
 0x228   :  { %340 = vrot.lane.b32.xlu1 %v161_v44, %s2151_s28  ;;  %v487_v44 = vrot.slane %v2267_v36, 6 }
 0x292   :  { %v246_v45 = vpop.permute.xlu1 %245 }
 0x293   :  { %v248_v46 = vmul.f32 %v1900_v30, %v246_v45 }
 0x295   :  { %v249_v47 = vpack.c.bf16 %v248_v46, %v248_v46 }
 0x296   :  { %v255_v48 = vpop.permute.xlu1 %254 }
 0x297   :  { %251 = vrot.lane.b32.xlu0 %v249_v47, %s2151_s28 }
 0x29a   :  { %v341_v1 = vpop.permute.xlu1 %340 }
 0x309   :  { %v252_v49 = vpop.permute.xlu0 %251 }
 0x30a   :  { %v258_v50 = vsel %vm176_vm4, %v252_v49, %v255_v48 }
 0x30b   :  { %1720 = vmatmul.mubr.msk.bf16.vlgmr.msra.gmra.mrb[0].mxu0 %vm289_vm5, %v258_v50 }
 0x30c   :  { %1740 = vmatpush3.bf16.msra.mxu0 %v2270_v37  ;;  %1747 = vmatprep.mubr.msk.bf16.mxu0 %vm2160_vm1, %v2159_v0 }
 0x30d   :  { %1741 = vmatprep.subr.bf16.mxu0 %v2159_v0 }
 0x310   :  { %1742 = vmatpush3.bf16.msra.mxu0 %v2273_v38 }
 0x311   :  { %1743 = vmatprep.subr.bf16.mxu0 %v2159_v0 }
 0x314   :  { %1744 = vmatpush3.bf16.msra.mxu0 %v2277_v40 }
 0x315   :  { %1745 = vmatprep.subr.bf16.mxu0 %v2159_v0 }
 0x318   :  { %1746 = vmatpush3.bf16.msra.mxu0 %v2282_v43 }
 0x319   :  { %1771 = vmatprep.subr.bf16.mxu0 %v2159_v0 }
 0x3de   :  { %v326_v52 = vpop.f32.mrb[0].mxu0 }
 0x3df   :  { %v327_v53 = vadd.f32 %v2305_v51, %v326_v52  ;;  %v1721_v54 = vpop.f32.mrb[1].mxu0 }
 0x3e0   :  { %v329_v55 = vpop.f32.mrb[2].mxu0 }
 0x3e1   :  { %1903 = vtanh.f32 %v327_v53  ;;  %v1722_v56 = vpop.f32.mrb[3].mxu0  ;;  %v1594_v58 = vmul.f32 -1.442695, %v327_v53 }
 0x3e3   :  { %1905 = vpow2.f32 %v1594_v58 }
 0x3eb   :  { %v1904_v57 = vpop.eup %1903 }
 0x3ec   :  { %345 = vrot.lane.b32.xlu0 %v1904_v57, %s2157_s0 }
 0x3ed   :  { %v1906_v59 = vpop.eup %1905 }
 0x3ee   :  { %v335_v60 = vadd.f32 1.0, %v1906_v59 }
 0x3f0   :  { %1907 = vrcp.f32 %v335_v60 }
 0x3fa   :  { %v1908_v61 = vpop.eup %1907 }
 0x3fb   :  { %v343_v2 = vmul.f32 %v1908_v61, %v341_v1 }
 0x45e   :  { %v346_v62 = vpop.permute.xlu0 %345 }
 0x45f   :  { %v348_v63 = vmul.f32 %v1908_v61, %v346_v62 }
 0x461   :  { %350 = vrot.lane.b32.xlu0 %v348_v63, %s2151_s28 }
 0x4d3   :  { %v351_v3 = vpop.permute.xlu0 %350 }
 0x4d4   :  { %v2310_v4 = vadd.f32 %v351_v3, %v343_v2 }
 0x4d6   :  { %1909 = vtanh.f32 %v2310_v4 }
 0x4e0   :  { %v1910_v7 = vpop.eup %1909 }
 0x4e1   :  { %356 = vrot.lane.b32.xlu1 %v1910_v7, %s2157_s0 }
 0x553   :  { %v357_v8 = vpop.permute.xlu1 %356 }
 0x554   :  { %v359_v11 = vmul.f32 %v1908_v61, %v357_v8 }
 0x556   :  { %v360_v12 = vpack.c.bf16 %v359_v11, %v359_v11 }
 0x558   :  { %368 = vrot.lane.b32.xlu0 %v360_v12, %s2151_s28 }
 0x5ca   :  { %v369_v13 = vpop.permute.xlu0 %368 }
 0x5cb   :  { %1728 = vmatmul.mubr.msk.bf16.vlgmr.msra.gmra.mrb[8].mxu1 %vm176_vm4, %v369_v13 }
 0x5cc   :  { %1732 = vmatpush3.bf16.msra.mxu1 %v2242_v9  ;;  %1735 = vmatprep.mubr.msk.bf16.mxu1 %vm2160_vm1, %v2159_v0 }
 0x5cd   :  { %1733 = vmatprep.subr.bf16.mxu1 %v2159_v0 }
 0x5d0   :  { %1734 = vmatpush3.bf16.msra.mxu1 %v2246_v10 }
 0x5d1   :  { %1751 = vmatprep.subr.bf16.mxu1 %v2159_v0 }
 0x5d3   :  { %1736 = vmatmul.mubr.msk.bf16.vlgmr.msra.gmra.mrb[12].mxu1 %vm176_vm4, %v252_v49  ;;  %v510_v49 = vrot.slane %v360_v12, 7 }
 0x5d4   :  { %1752 = vmatpush3.bf16.msra.mxu1 %v2242_v9  ;;  %1755 = vmatprep.mubr.msk.bf16.mxu1 %vm2160_vm1, %v2159_v0 }
 0x5d5   :  { %1753 = vmatprep.subr.bf16.mxu1 %v2159_v0 }
 0x5d8   :  { %1754 = vmatpush3.bf16.msra.mxu1 %v2246_v10 }
 0x5d9   :  { %1759 = vmatprep.subr.bf16.mxu1 %v2159_v0 }
 0x69e   :  { %v419_v15 = vpop.f32.mrb[8].mxu1 }
 0x69f   :  { %v420_v16 = vadd.f32 %v1595_v14, %v419_v15  ;;  %v1729_v18 = vpop.f32.mrb[9].mxu1 }
 0x6a0   :  { %v422_v20 = vpop.f32.mrb[10].mxu1 }
 0x6a1   :  { %v1599_v21 = vmul.f32 -1.442695, %v420_v16  ;;  %v1730_v22 = vpop.f32.mrb[11].mxu1 }
 0x6a3   :  { %1911 = vpow2.f32 %v1599_v21 }
 0x6a6   :  { %v469_v23 = vpop.f32.mrb[12].mxu1 }
 0x6a7   :  { %v476_v24 = vrot.slane %v469_v23, 6  ;;  %v1737_v25 = vpop.f32.mrb[13].mxu1 }
 0x6a8   :  { %v472_v26 = vpop.f32.mrb[14].mxu1 }
 0x6a9   :  { %v478_v27 = vadd.f32 %v476_v24, %v2261_v19  ;;  %v1738_v28 = vpop.f32.mrb[15].mxu1 }
 0x6ab   :  { %1913 = vtanh.f32 %v478_v27  ;;  %v1601_v33 = vmul.f32 -1.442695, %v478_v27 }
 0x6ad   :  { %v1912_v29 = vpop.eup %1911 }
 0x6ae   :  { %v428_v30 = vadd.f32 1.0, %v1912_v29 }
 0x6b0   :  { %1915 = vrcp.f32 %v428_v30 }
 0x6b1   :  { %1917 = vpow2.f32 %v1601_v33 }
 0x6b5   :  { %v1914_v31 = vpop.eup %1913 }
 0x6b6   :  { %491 = vrot.lane.b32.xlu1 %v1914_v31, %s2157_s0 }
 0x6ba   :  { %v1916_v32 = vpop.eup %1915 }
 0x6bb   :  { %432 = vst.msk [vmem:[#allocation8] sm:$0x3] %vm431_vm6, %v1916_v32  ;;  %v1918_v34 = vpop.eup %1917 }
 0x6bc   :  { %v482_v35 = vadd.f32 1.0, %v1918_v34 }
 0x6be   :  { %1919 = vrcp.f32 %v482_v35 }
 0x6c8   :  { %v1920_v39 = vpop.eup %1919 }
 0x6c9   :  { %v489_v45 = vmul.f32 %v1920_v39, %v487_v44 }
 0x728   :  { %v492_v41 = vpop.permute.xlu1 %491 }
 0x729   :  { %v494_v42 = vmul.f32 %v1920_v39, %v492_v41 }
 0x72b   :  { %496 = vrot.lane.b32.xlu0 %v494_v42, %s2151_s28 }
 0x79d   :  { %v497_v46 = vpop.permute.xlu0 %496 }
 0x79e   :  { %v2338_v47 = vadd.f32 %v497_v46, %v489_v45 }
 0x7a0   :  { %1921 = vtanh.f32 %v2338_v47  ;;  %v644_v27 = vrot.slane %v2338_v47, 6 }
 0x7aa   :  { %v1922_v48 = vpop.eup %1921 }
 0x7ab   :  { %502 = vrot.lane.b32.xlu1 %v1922_v48, %s2157_s0 }
 0x7af   :  { %511 = vrot.lane.b32.xlu1 %v510_v49, %s2157_s0 }
 0x81d   :  { %v503_v50 = vpop.permute.xlu1 %502 }
 0x81e   :  { %v505_v52 = vmul.f32 %v1920_v39, %v503_v50 }
 0x820   :  { %v506_v53 = vpack.c.bf16 %v505_v52, %v505_v52 }
 0x821   :  { %v512_v36 = vpop.permute.xlu1 %511 }
 0x822   :  { %508 = vrot.lane.b32.xlu0 %v506_v53, %s2151_s28  ;;  %v586_v54 = vrot.slane %v506_v53, 1 }
 0x826   :  { %587 = vrot.lane.b32.xlu0 %v586_v54, %s2151_s28 }
 0x894   :  { %v509_v55 = vpop.permute.xlu0 %508 }
 0x895   :  { %v515_v56 = vsel %vm176_vm4, %v509_v55, %v512_v36 }
 0x896   :  { %v517_v57 = vrot.slane %v515_v56, 1 }
 0x898   :  { %v588_v58 = vpop.permute.xlu0 %587  ;;  %1748 = vmatmul.mubr.msk.bf16.vlgmr.msra.gmra.mrb[4].mxu0 %vm289_vm5, %v517_v57 }
 0x899   :  { %1756 = vmatmul.mubr.msk.bf16.vlgmr.msra.gmra.mrb[16].mxu1 %vm176_vm4, %v588_v58  ;;  %1772 = vmatpush3.bf16.msra.mxu0 %v2242_v9 }
 0x89a   :  { %1760 = vmatpush3.bf16.msra.mxu1 %v2270_v37  ;;  %1773 = vmatprep.subr.bf16.mxu0 %v2159_v0 }
 0x89b   :  { %1761 = vmatprep.subr.bf16.mxu1 %v2159_v0  ;;  %1767 = vmatprep.mubr.msk.bf16.mxu1 %vm2160_vm1, %v2159_v0 }
 0x89c   :  { %1775 = vmatprep.mubr.msk.bf16.mxu0 %vm2160_vm1, %v2159_v0 }
 0x89d   :  { %1774 = vmatpush3.bf16.msra.mxu0 %v2246_v10 }
 0x89e   :  { %1762 = vmatpush3.bf16.msra.mxu1 %v2273_v38  ;;  %1779 = vmatprep.subr.bf16.mxu0 %v2159_v0 }
 0x89f   :  { %1763 = vmatprep.subr.bf16.mxu1 %v2159_v0 }
 0x8a2   :  { %1764 = vmatpush3.bf16.msra.mxu1 %v2277_v40 }
 0x8a3   :  { %1765 = vmatprep.subr.bf16.mxu1 %v2159_v0 }
 0x8a6   :  { %1766 = vmatpush3.bf16.msra.mxu1 %v2282_v43 }
 0x8a7   :  { %1791 = vmatprep.subr.bf16.mxu1 %v2159_v0 }
 0x96b   :  { %v555_v59 = vpop.f32.mrb[4].mxu0 }
 0x96c   :  { %v556_v60 = vadd.f32 %v2305_v51, %v555_v59  ;;  %v1749_v61 = vpop.f32.mrb[5].mxu0  ;;  %v626_v62 = vpop.f32.mrb[16].mxu1 }
 0x96d   :  { %v633_v63 = vrot.slane %v626_v62, 4  ;;  %v558_v1 = vpop.f32.mrb[6].mxu0  ;;  %v1757_v2 = vpop.f32.mrb[17].mxu1 }
 0x96e   :  { %1923 = vtanh.f32 %v556_v60  ;;  %v1750_v3 = vpop.f32.mrb[7].mxu0  ;;  %v629_v5 = vpop.f32.mrb[18].mxu1  ;;  %v1603_v12 = vmul.f32 -1.442695, %v556_v60 }
 0x96f   :  { %v635_v6 = vadd.f32 %v633_v63, %v2261_v19  ;;  %v1758_v7 = vpop.f32.mrb[19].mxu1 }
 0x971   :  { %1925 = vtanh.f32 %v635_v6  ;;  %v1605_v13 = vmul.f32 -1.442695, %v635_v6 }
 0x972   :  { %1927 = vpow2.f32 %v1603_v12 }
 0x973   :  { %1929 = vpow2.f32 %v1605_v13 }
 0x978   :  { %v1924_v8 = vpop.eup %1923 }
 0x979   :  { %570 = vrot.lane.b32.xlu1 %v1924_v8, %s2157_s0 }
 0x97b   :  { %v1926_v11 = vpop.eup %1925 }
 0x97c   :  { %648 = vrot.lane.b32.xlu0 %v1926_v11, %s2157_s0  ;;  %v1928_v14 = vpop.eup %1927 }
 0x97d   :  { %v1930_v15 = vpop.eup %1929  ;;  %v564_v16 = vadd.f32 1.0, %v1928_v14 }
 0x97e   :  { %v639_v18 = vadd.f32 1.0, %v1930_v15 }
 0x97f   :  { %1931 = vrcp.f32 %v564_v16 }
 0x980   :  { %1933 = vrcp.f32 %v639_v18 }
 0x989   :  { %v1932_v20 = vpop.eup %1931 }
 0x98a   :  { %v1934_v23 = vpop.eup %1933  ;;  %v568_v26 = vmul.f32 %v1932_v20, %v2310_v4 }
 0x98b   :  { %v646_v30 = vmul.f32 %v1934_v23, %v644_v27 }
 0x9eb   :  { %v571_v21 = vpop.permute.xlu1 %570 }
 0x9ec   :  { %v573_v22 = vmul.f32 %v1932_v20, %v571_v21 }
 0x9ee   :  { %575 = vrot.lane.b32.xlu1 %v573_v22, %s2151_s28  ;;  %v649_v24 = vpop.permute.xlu0 %648 }
 0x9ef   :  { %v651_v25 = vmul.f32 %v1934_v23, %v649_v24 }
 0x9f1   :  { %653 = vrot.lane.b32.xlu0 %v651_v25, %s2151_s28 }
 0xa60   :  { %v576_v28 = vpop.permute.xlu1 %575 }
 0xa61   :  { %v2372_v29 = vadd.f32 %v576_v28, %v568_v26 }
 0xa63   :  { %1935 = vtanh.f32 %v2372_v29  ;;  %v654_v31 = vpop.permute.xlu0 %653 }
 0xa64   :  { %v2375_v32 = vadd.f32 %v654_v31, %v646_v30 }
 0xa66   :  { %1937 = vtanh.f32 %v2375_v32  ;;  %v802_v18 = vrot.slane %v2375_v32, 6 }
 0xa6d   :  { %v1936_v33 = vpop.eup %1935 }
 0xa6e   :  { %581 = vrot.lane.b32.xlu1 %v1936_v33, %s2157_s0 }
 0xa70   :  { %v1938_v34 = vpop.eup %1937 }
 0xa71   :  { %659 = vrot.lane.b32.xlu0 %v1938_v34, %s2157_s0 }
 0xae0   :  { %v582_v4 = vpop.permute.xlu1 %581 }
 0xae1   :  { %v584_v35 = vmul.f32 %v1932_v20, %v582_v4 }
 0xae3   :  { %v585_v39 = vpack.c.bf16 %v584_v35, %v584_v35  ;;  %v660_v41 = vpop.permute.xlu0 %659 }
 0xae4   :  { %v662_v42 = vmul.f32 %v1934_v23, %v660_v41 }
 0xae5   :  { %v668_v44 = vrot.slane %v585_v39, 6 }
 0xae6   :  { %v663_v45 = vpack.c.bf16 %v662_v42, %v662_v42 }
 0xae7   :  { %669 = vrot.lane.b32.xlu0 %v668_v44, %s2157_s0 }
 0xae8   :  { %665 = vrot.lane.b32.xlu1 %v663_v45, %s2151_s28  ;;  %v744_v46 = vrot.slane %v663_v45, 2 }
 0xaec   :  { %745 = vrot.lane.b32.xlu1 %v744_v46, %s2151_s28 }
 0xb59   :  { %v670_v47 = vpop.permute.xlu0 %669 }
 0xb5a   :  { %v666_v48 = vpop.permute.xlu1 %665 }
 0xb5b   :  { %v673_v49 = vsel %vm176_vm4, %v666_v48, %v670_v47 }
 0xb5c   :  { %v675_v50 = vrot.slane %v673_v49, 2 }
 0xb5e   :  { %v746_v52 = vpop.permute.xlu1 %745  ;;  %1768 = vmatmul.mubr.msk.bf16.vlgmr.msra.gmra.mrb[20].mxu1 %vm289_vm5, %v675_v50 }
 0xb5f   :  { %1776 = vmatmul.mubr.msk.bf16.vlgmr.msra.gmra.mrb[8].mxu0 %vm176_vm4, %v746_v52  ;;  %1792 = vmatpush3.bf16.msra.mxu1 %v2242_v9 }
 0xb60   :  { %1780 = vmatpush3.bf16.msra.mxu0 %v2270_v37  ;;  %1793 = vmatprep.subr.bf16.mxu1 %v2159_v0 }
 0xb61   :  { %1781 = vmatprep.subr.bf16.mxu0 %v2159_v0  ;;  %1787 = vmatprep.mubr.msk.bf16.mxu0 %vm2160_vm1, %v2159_v0 }
 0xb62   :  { %1795 = vmatprep.mubr.msk.bf16.mxu1 %vm2160_vm1, %v2159_v0 }
 0xb63   :  { %1794 = vmatpush3.bf16.msra.mxu1 %v2246_v10 }
 0xb64   :  { %1782 = vmatpush3.bf16.msra.mxu0 %v2273_v38  ;;  %1799 = vmatprep.subr.bf16.mxu1 %v2159_v0 }
 0xb65   :  { %1783 = vmatprep.subr.bf16.mxu0 %v2159_v0 }
 0xb68   :  { %1784 = vmatpush3.bf16.msra.mxu0 %v2277_v40 }
 0xb69   :  { %1785 = vmatprep.subr.bf16.mxu0 %v2159_v0 }
 0xb6c   :  { %1786 = vmatpush3.bf16.msra.mxu0 %v2282_v43 }
 0xb6d   :  { %1811 = vmatprep.subr.bf16.mxu0 %v2159_v0 }
 0xc31   :  { %v713_v53 = vpop.f32.mrb[20].mxu1 }
 0xc32   :  { %v714_v54 = vadd.f32 %v2305_v51, %v713_v53  ;;  %v1769_v36 = vpop.f32.mrb[21].mxu1  ;;  %v784_v55 = vpop.f32.mrb[8].mxu0 }
 0xc33   :  { %v791_v56 = vrot.slane %v784_v55, 2  ;;  %v716_v57 = vpop.f32.mrb[22].mxu1  ;;  %v1777_v58 = vpop.f32.mrb[9].mxu0 }
 0xc34   :  { %1939 = vtanh.f32 %v714_v54  ;;  %v1770_v59 = vpop.f32.mrb[23].mxu1  ;;  %v787_v60 = vpop.f32.mrb[10].mxu0  ;;  %v1607_v2 = vmul.f32 -1.442695, %v714_v54 }
 0xc35   :  { %v793_v61 = vadd.f32 %v791_v56, %v2261_v19  ;;  %v1778_v62 = vpop.f32.mrb[11].mxu0 }
 0xc37   :  { %1941 = vtanh.f32 %v793_v61  ;;  %v1609_v3 = vmul.f32 -1.442695, %v793_v61 }
 0xc38   :  { %1943 = vpow2.f32 %v1607_v2 }
 0xc39   :  { %1945 = vpow2.f32 %v1609_v3 }
 0xc3e   :  { %v1940_v63 = vpop.eup %1939 }
 0xc3f   :  { %728 = vrot.lane.b32.xlu0 %v1940_v63, %s2157_s0 }
 0xc41   :  { %v1942_v1 = vpop.eup %1941 }
 0xc42   :  { %806 = vrot.lane.b32.xlu1 %v1942_v1, %s2157_s0  ;;  %v1944_v5 = vpop.eup %1943 }
 0xc43   :  { %v1946_v6 = vpop.eup %1945  ;;  %v722_v7 = vadd.f32 1.0, %v1944_v5 }
 0xc44   :  { %v797_v8 = vadd.f32 1.0, %v1946_v6 }
 0xc45   :  { %1947 = vrcp.f32 %v722_v7 }
 0xc46   :  { %1949 = vrcp.f32 %v797_v8 }
 0xc4f   :  { %v1948_v11 = vpop.eup %1947 }
 0xc50   :  { %v1950_v13 = vpop.eup %1949  ;;  %v726_v16 = vmul.f32 %v1948_v11, %v2372_v29 }
 0xc51   :  { %v804_v22 = vmul.f32 %v1950_v13, %v802_v18 }
 0xcb1   :  { %v729_v19 = vpop.permute.xlu0 %728 }
 0xcb2   :  { %v731_v12 = vmul.f32 %v1948_v11, %v729_v19 }
 0xcb4   :  { %v807_v14 = vpop.permute.xlu1 %806  ;;  %733 = vrot.lane.b32.xlu0 %v731_v12, %s2151_s28 }
 0xcb5   :  { %v809_v15 = vmul.f32 %v1950_v13, %v807_v14 }
 0xcb7   :  { %811 = vrot.lane.b32.xlu1 %v809_v15, %s2151_s28 }
 0xd26   :  { %v734_v20 = vpop.permute.xlu0 %733 }
 0xd27   :  { %v2410_v21 = vadd.f32 %v734_v20, %v726_v16 }
 0xd29   :  { %1951 = vtanh.f32 %v2410_v21  ;;  %v812_v23 = vpop.permute.xlu1 %811 }
 0xd2a   :  { %v2413_v24 = vadd.f32 %v812_v23, %v804_v22 }
 0xd2c   :  { %1953 = vtanh.f32 %v2413_v24  ;;  %v957_v6 = vrot.slane %v2413_v24, 6 }
 0xd33   :  { %v1952_v25 = vpop.eup %1951 }
 0xd34   :  { %739 = vrot.lane.b32.xlu0 %v1952_v25, %s2157_s0 }
 0xd36   :  { %v1954_v26 = vpop.eup %1953 }
 0xd37   :  { %817 = vrot.lane.b32.xlu1 %v1954_v26, %s2157_s0 }
 0xda6   :  { %v740_v27 = vpop.permute.xlu0 %739 }
 0xda7   :  { %v742_v28 = vmul.f32 %v1948_v11, %v740_v27 }
 0xda9   :  { %v743_v29 = vpack.c.bf16 %v742_v28, %v742_v28  ;;  %v818_v30 = vpop.permute.xlu1 %817 }
 0xdaa   :  { %v820_v31 = vmul.f32 %v1950_v13, %v818_v30 }
 0xdab   :  { %v826_v32 = vrot.slane %v743_v29, 5 }
 0xdac   :  { %v821_v33 = vpack.c.bf16 %v820_v31, %v820_v31 }
 0xdad   :  { %827 = vrot.lane.b32.xlu1 %v826_v32, %s2157_s0 }
 0xdae   :  { %823 = vrot.lane.b32.xlu0 %v821_v33, %s2151_s28  ;;  %v902_v34 = vrot.slane %v821_v33, 3 }
 0xdb2   :  { %903 = vrot.lane.b32.xlu0 %v902_v34, %s2151_s28 }
 0xe1f   :  { %v828_v4 = vpop.permute.xlu1 %827 }
 0xe20   :  { %v824_v35 = vpop.permute.xlu0 %823 }
 0xe21   :  { %v831_v39 = vsel %vm176_vm4, %v824_v35, %v828_v4 }
 0xe22   :  { %v833_v41 = vrot.slane %v831_v39, 3 }
 0xe24   :  { %1788 = vmatmul.mubr.msk.bf16.vlgmr.msra.gmra.mrb[12].mxu0 %vm289_vm5, %v833_v41  ;;  %v904_v42 = vpop.permute.xlu0 %903 }
 0xe25   :  { %1796 = vmatmul.mubr.msk.bf16.vlgmr.msra.gmra.mrb[24].mxu1 %vm176_vm4, %v904_v42  ;;  %1812 = vmatpush3.bf16.msra.mxu0 %v2242_v9 }
 0xe26   :  { %1800 = vmatpush3.bf16.msra.mxu1 %v2270_v37  ;;  %1813 = vmatprep.subr.bf16.mxu0 %v2159_v0 }
 0xe27   :  { %1801 = vmatprep.subr.bf16.mxu1 %v2159_v0  ;;  %1815 = vmatprep.mubr.msk.bf16.mxu0 %vm2160_vm1, %v2159_v0 }
 0xe28   :  { %1807 = vmatprep.mubr.msk.bf16.mxu1 %vm2160_vm1, %v2159_v0 }
 0xe29   :  { %1814 = vmatpush3.bf16.msra.mxu0 %v2246_v10 }
 0xe2a   :  { %1802 = vmatpush3.bf16.msra.mxu1 %v2273_v38  ;;  %1819 = vmatprep.subr.bf16.mxu0 %v2159_v0 }
 0xe2b   :  { %1803 = vmatprep.subr.bf16.mxu1 %v2159_v0 }
 0xe2e   :  { %1804 = vmatpush3.bf16.msra.mxu1 %v2277_v40 }
 0xe2f   :  { %1805 = vmatprep.subr.bf16.mxu1 %v2159_v0 }
 0xe32   :  { %1806 = vmatpush3.bf16.msra.mxu1 %v2282_v43 }
 0xe33   :  { %1831 = vmatprep.subr.bf16.mxu1 %v2159_v0 }
 0xef7   :  { %v871_v44 = vpop.f32.mrb[12].mxu0 }
 0xef8   :  { %v872_v45 = vadd.f32 %v2305_v51, %v871_v44  ;;  %v1789_v46 = vpop.f32.mrb[13].mxu0  ;;  %v942_v47 = vpop.f32.mrb[24].mxu1 }
 0xef9   :  { %v948_v48 = vadd.f32 %v942_v47, %v2259_v17  ;;  %v874_v49 = vpop.f32.mrb[14].mxu0  ;;  %v1797_v50 = vpop.f32.mrb[25].mxu1 }
 0xefa   :  { %1955 = vtanh.f32 %v872_v45  ;;  %v1790_v52 = vpop.f32.mrb[15].mxu0  ;;  %v945_v53 = vpop.f32.mrb[26].mxu1  ;;  %v1611_v56 = vmul.f32 -1.442695, %v872_v45 }
 0xefb   :  { %1957 = vtanh.f32 %v948_v48  ;;  %v1798_v54 = vpop.f32.mrb[27].mxu1  ;;  %v1613_v57 = vmul.f32 -1.442695, %v948_v48 }
 0xefc   :  { %1959 = vpow2.f32 %v1611_v56 }
 0xefd   :  { %1961 = vpow2.f32 %v1613_v57 }
 0xf04   :  { %v1956_v36 = vpop.eup %1955 }
 0xf05   :  { %v1958_v55 = vpop.eup %1957  ;;  %886 = vrot.lane.b32.xlu1 %v1956_v36, %s2157_s0 }
 0xf06   :  { %961 = vrot.lane.b32.xlu0 %v1958_v55, %s2157_s0  ;;  %v1960_v58 = vpop.eup %1959 }
 0xf07   :  { %v1962_v59 = vpop.eup %1961  ;;  %v880_v60 = vadd.f32 1.0, %v1960_v58 }
 0xf08   :  { %v952_v61 = vadd.f32 1.0, %v1962_v59 }
 0xf09   :  { %1963 = vrcp.f32 %v880_v60 }
 0xf0a   :  { %1965 = vrcp.f32 %v952_v61 }
 0xf13   :  { %v1964_v62 = vpop.eup %1963 }
 0xf14   :  { %v1966_v1 = vpop.eup %1965  ;;  %v884_v7 = vmul.f32 %v1964_v62, %v2410_v21 }
 0xf15   :  { %v959_v11 = vmul.f32 %v1966_v1, %v957_v6 }
 0xf77   :  { %v887_v63 = vpop.permute.xlu1 %886 }
 0xf78   :  { %v889_v2 = vmul.f32 %v1964_v62, %v887_v63  ;;  %v962_v3 = vpop.permute.xlu0 %961 }
 0xf79   :  { %v964_v5 = vmul.f32 %v1966_v1, %v962_v3 }
 0xf7a   :  { %891 = vrot.lane.b32.xlu1 %v889_v2, %s2151_s28 }
 0xf7b   :  { %966 = vrot.lane.b32.xlu0 %v964_v5, %s2151_s28 }
 0xfec   :  { %v892_v8 = vpop.permute.xlu1 %891 }
 0xfed   :  { %v2448_v19 = vadd.f32 %v892_v8, %v884_v7  ;;  %v967_v12 = vpop.permute.xlu0 %966 }
 0xfee   :  { %v2450_v13 = vadd.f32 %v967_v12, %v959_v11 }
 0xfef   :  { %1967 = vtanh.f32 %v2448_v19 }
 0xff0   :  { %1969 = vtanh.f32 %v2450_v13  ;;  %v1107_v56 = vrot.slane %v2450_v13, 6 }
 0xff9   :  { %v1968_v14 = vpop.eup %1967 }
 0xffa   :  { %v1970_v15 = vpop.eup %1969  ;;  %897 = vrot.lane.b32.xlu1 %v1968_v14, %s2157_s0 }
 0xffb   :  { %972 = vrot.lane.b32.xlu0 %v1970_v15, %s2157_s0 }
0x106c   :  { %v898_v16 = vpop.permute.xlu1 %897 }
0x106d   :  { %v900_v18 = vmul.f32 %v1964_v62, %v898_v16  ;;  %v973_v20 = vpop.permute.xlu0 %972 }
0x106e   :  { %v975_v21 = vmul.f32 %v1966_v1, %v973_v20 }
0x106f   :  { %v901_v22 = vpack.c.bf16 %v900_v18, %v900_v18 }
0x1070   :  { %v976_v23 = vpack.c.bf16 %v975_v21, %v975_v21 }
0x1071   :  { %981 = vrot.lane.b32.xlu0 %v901_v22, %s2157_s0 }
0x1072   :  { %978 = vrot.lane.b32.xlu1 %v976_v23, %s2151_s28 }
0x10e3   :  { %v982_v24 = vpop.permute.xlu0 %981 }
0x10e4   :  { %v979_v25 = vpop.permute.xlu1 %978 }
0x10e5   :  { %v985_v26 = vsel %vm176_vm4, %v979_v25, %v982_v24  ;;  %1816 = vmatmul.mubr.msk.bf16.vlgmr.msra.gmra.mrb[16].mxu0 %vm176_vm4, %v979_v25 }
0x10e6   :  { %1808 = vmatmul.mubr.msk.bf16.vlgmr.msra.gmra.mrb[28].mxu1 %vm289_vm5, %v985_v26  ;;  %1820 = vmatpush3.bf16.msra.mxu0 %v2270_v37 }
0x10e7   :  { %1821 = vmatprep.subr.bf16.mxu0 %v2159_v0  ;;  %1832 = vmatpush3.bf16.msra.mxu1 %v2242_v9 }
0x10e8   :  { %1833 = vmatprep.subr.bf16.mxu1 %v2159_v0  ;;  %1827 = vmatprep.mubr.msk.bf16.mxu0 %vm2160_vm1, %v2159_v0 }
0x10e9   :  { %1835 = vmatprep.mubr.msk.bf16.mxu1 %vm2160_vm1, %v2159_v0 }
0x10ea   :  { %1822 = vmatpush3.bf16.msra.mxu0 %v2273_v38 }
0x10eb   :  { %1823 = vmatprep.subr.bf16.mxu0 %v2159_v0  ;;  %1834 = vmatpush3.bf16.msra.mxu1 %v2246_v10 }
0x10ec   :  { %1839 = vmatprep.subr.bf16.mxu1 %v2159_v0 }
0x10ee   :  { %1824 = vmatpush3.bf16.msra.mxu0 %v2277_v40 }
0x10ef   :  { %1825 = vmatprep.subr.bf16.mxu0 %v2159_v0 }
0x10f2   :  { %1826 = vmatpush3.bf16.msra.mxu0 %v2282_v43 }
0x10f3   :  { %1851 = vmatprep.subr.bf16.mxu0 %v2159_v0 }
0x11b8   :  { %v1089_v27 = vpop.f32.mrb[16].mxu0 }
0x11b9   :  { %v1096_v28 = vrot.slane %v1089_v27, 6  ;;  %v1022_v29 = vpop.f32.mrb[28].mxu1  ;;  %v1817_v30 = vpop.f32.mrb[17].mxu0 }
0x11ba   :  { %v1023_v31 = vadd.f32 %v2305_v51, %v1022_v29  ;;  %v1809_v32 = vpop.f32.mrb[29].mxu1  ;;  %v1092_v33 = vpop.f32.mrb[18].mxu0 }
0x11bb   :  { %v1098_v34 = vadd.f32 %v1096_v28, %v2259_v17  ;;  %v1025_v4 = vpop.f32.mrb[30].mxu1  ;;  %v1818_v35 = vpop.f32.mrb[19].mxu0 }
0x11bc   :  { %1971 = vtanh.f32 %v1023_v31  ;;  %v1810_v39 = vpop.f32.mrb[31].mxu1  ;;  %v1615_v44 = vmul.f32 -1.442695, %v1023_v31 }
0x11bd   :  { %1973 = vtanh.f32 %v1098_v34  ;;  %v1617_v45 = vmul.f32 -1.442695, %v1098_v34 }
0x11be   :  { %1975 = vpow2.f32 %v1615_v44 }
0x11bf   :  { %1977 = vpow2.f32 %v1617_v45 }
0x11c6   :  { %v1972_v41 = vpop.eup %1971 }
0x11c7   :  { %v1974_v42 = vpop.eup %1973  ;;  %1037 = vrot.lane.b32.xlu1 %v1972_v41, %s2157_s0 }
0x11c8   :  { %1111 = vrot.lane.b32.xlu0 %v1974_v42, %s2157_s0  ;;  %v1976_v46 = vpop.eup %1975 }
0x11c9   :  { %v1978_v47 = vpop.eup %1977  ;;  %v1031_v48 = vadd.f32 1.0, %v1976_v46 }
0x11ca   :  { %v1102_v49 = vadd.f32 1.0, %v1978_v47 }
0x11cb   :  { %1979 = vrcp.f32 %v1031_v48 }
0x11cc   :  { %1981 = vrcp.f32 %v1102_v49 }
0x11d5   :  { %v1980_v50 = vpop.eup %1979 }
0x11d6   :  { %v1982_v53 = vpop.eup %1981  ;;  %v1035_v57 = vmul.f32 %v1980_v50, %v2448_v19 }
0x11d7   :  { %v1109_v59 = vmul.f32 %v1982_v53, %v1107_v56 }
0x1239   :  { %v1038_v52 = vpop.permute.xlu1 %1037 }
0x123a   :  { %v1040_v54 = vmul.f32 %v1980_v50, %v1038_v52  ;;  %v1112_v36 = vpop.permute.xlu0 %1111 }
0x123b   :  { %v1114_v55 = vmul.f32 %v1982_v53, %v1112_v36 }
0x123c   :  { %1042 = vrot.lane.b32.xlu1 %v1040_v54, %s2151_s28 }
0x123d   :  { %1116 = vrot.lane.b32.xlu0 %v1114_v55, %s2151_s28 }
0x12ae   :  { %v1043_v58 = vpop.permute.xlu1 %1042 }
0x12af   :  { %v2485_v60 = vadd.f32 %v1043_v58, %v1035_v57  ;;  %v1117_v61 = vpop.permute.xlu0 %1116 }
0x12b0   :  { %v2487_v62 = vadd.f32 %v1117_v61, %v1109_v59 }
0x12b1   :  { %1983 = vtanh.f32 %v2485_v60 }
0x12b2   :  { %1985 = vtanh.f32 %v2487_v62  ;;  %v1265_v42 = vrot.slane %v2487_v62, 6 }
0x12bb   :  { %v1984_v63 = vpop.eup %1983 }
0x12bc   :  { %v1986_v1 = vpop.eup %1985  ;;  %1048 = vrot.lane.b32.xlu1 %v1984_v63, %s2157_s0 }
0x12bd   :  { %1122 = vrot.lane.b32.xlu0 %v1986_v1, %s2157_s0  ;;  %v2027_v1 = vld [vmem:[#allocation7 + $0x40] sm:$0xff]  }
0x132e   :  { %v1049_v2 = vpop.permute.xlu1 %1048 }
0x132f   :  { %v1051_v3 = vmul.f32 %v1980_v50, %v1049_v2  ;;  %v1123_v5 = vpop.permute.xlu0 %1122  ;;  %v2028_v2 = vld [vmem:[#allocation7 + $0x48] sm:$0xff]  }
0x1330   :  { %v1125_v6 = vmul.f32 %v1982_v53, %v1123_v5  ;;  %v2030_v5 = vld [vmem:[#allocation7 + $0x58] sm:$0xff]  }
0x1331   :  { %v1052_v7 = vpack.c.bf16 %v1051_v3, %v1051_v3  ;;  %v2029_v3 = vld [vmem:[#allocation7 + $0x50] sm:$0xff]  }
0x1332   :  { %v1126_v8 = vpack.c.bf16 %v1125_v6, %v1125_v6 }
0x1333   :  { %v1131_v11 = vrot.slane %v1052_v7, 7 }
0x1334   :  { %1128 = vrot.lane.b32.xlu1 %v1126_v8, %s2151_s28  ;;  %v1207_v19 = vrot.slane %v1126_v8, 1 }
0x1335   :  { %1132 = vrot.lane.b32.xlu0 %v1131_v11, %s2157_s0 }
0x1338   :  { %1208 = vrot.lane.b32.xlu1 %v1207_v19, %s2151_s28 }
0x13a6   :  { %v1129_v12 = vpop.permute.xlu1 %1128 }
0x13a7   :  { %v1133_v13 = vpop.permute.xlu0 %1132 }
0x13a8   :  { %v1136_v14 = vsel %vm176_vm4, %v1129_v12, %v1133_v13 }
0x13a9   :  { %v1138_v15 = vrot.slane %v1136_v14, 1 }
0x13aa   :  { %v1209_v16 = vpop.permute.xlu1 %1208 }
0x13ab   :  { %1828 = vmatmul.mubr.msk.bf16.vlgmr.msra.gmra.mrb[20].mxu0 %vm289_vm5, %v1138_v15  ;;  %1836 = vmatmul.mubr.msk.bf16.vlgmr.msra.gmra.mrb[32].mxu1 %vm176_vm4, %v1209_v16 }
0x13ac   :  { %1840 = vmatpush3.bf16.msra.mxu1 %v2270_v37  ;;  %1852 = vmatpush3.bf16.msra.mxu0 %v2242_v9 }
0x13ad   :  { %1841 = vmatprep.subr.bf16.mxu1 %v2159_v0  ;;  %1853 = vmatprep.subr.bf16.mxu0 %v2159_v0 }
0x13ae   :  { %1847 = vmatprep.mubr.msk.bf16.mxu1 %vm2160_vm1, %v2159_v0  ;;  %1855 = vmatprep.mubr.msk.bf16.mxu0 %vm2160_vm1, %v2159_v0 }
0x13b0   :  { %1842 = vmatpush3.bf16.msra.mxu1 %v2273_v38  ;;  %1854 = vmatpush3.bf16.msra.mxu0 %v2246_v10 }
0x13b1   :  { %1843 = vmatprep.subr.bf16.mxu1 %v2159_v0  ;;  %1859 = vmatprep.subr.bf16.mxu0 %v2159_v0 }
0x13b4   :  { %1844 = vmatpush3.bf16.msra.mxu1 %v2277_v40 }
0x13b5   :  { %1845 = vmatprep.subr.bf16.mxu1 %v2159_v0 }
0x13b8   :  { %1846 = vmatpush3.bf16.msra.mxu1 %v2282_v43 }
0x147e   :  { %v1176_v9 = vpop.f32.mrb[20].mxu0  ;;  %v1247_v37 = vpop.f32.mrb[32].mxu1 }
0x147f   :  { %v1177_v18 = vadd.f32 %v2305_v51, %v1176_v9  ;;  %v1254_v20 = vrot.slane %v1247_v37, 4  ;;  %v1829_v21 = vpop.f32.mrb[21].mxu0  ;;  %v1837_v22 = vpop.f32.mrb[33].mxu1 }
0x1480   :  { %v1179_v38 = vpop.f32.mrb[22].mxu0  ;;  %v1250_v23 = vpop.f32.mrb[34].mxu1 }
0x1481   :  { %1987 = vtanh.f32 %v1177_v18  ;;  %v1256_v10 = vadd.f32 %v1254_v20, %v2259_v17  ;;  %v1830_v24 = vpop.f32.mrb[23].mxu0  ;;  %v1838_v25 = vpop.f32.mrb[35].mxu1  ;;  %v1619_v43 = vmul.f32 -1.442695, %v1177_v18 }
0x1483   :  { %1989 = vtanh.f32 %v1256_v10  ;;  %v1621_v27 = vmul.f32 -1.442695, %v1256_v10 }
0x1484   :  { %1991 = vpow2.f32 %v1619_v43 }
0x1485   :  { %1993 = vpow2.f32 %v1621_v27 }
0x148b   :  { %v1988_v40 = vpop.eup %1987 }
0x148c   :  { %1191 = vrot.lane.b32.xlu0 %v1988_v40, %s2157_s0 }
0x148d   :  { %v1990_v26 = vpop.eup %1989 }
0x148e   :  { %1269 = vrot.lane.b32.xlu1 %v1990_v26, %s2157_s0  ;;  %v1992_v28 = vpop.eup %1991 }
0x148f   :  { %v1994_v29 = vpop.eup %1993  ;;  %v1185_v30 = vadd.f32 1.0, %v1992_v28 }
0x1490   :  { %v1260_v31 = vadd.f32 1.0, %v1994_v29 }
0x1491   :  { %1995 = vrcp.f32 %v1185_v30 }
0x1492   :  { %1997 = vrcp.f32 %v1260_v31 }
0x149b   :  { %v1996_v32 = vpop.eup %1995 }
0x149c   :  { %v1998_v4 = vpop.eup %1997  ;;  %v1189_v41 = vmul.f32 %v1996_v32, %v2485_v60 }
0x149d   :  { %v1267_v46 = vmul.f32 %v1998_v4, %v1265_v42 }
0x14fe   :  { %v1192_v33 = vpop.permute.xlu0 %1191 }
0x14ff   :  { %v1194_v34 = vmul.f32 %v1996_v32, %v1192_v33 }
0x1500   :  { %v1270_v35 = vpop.permute.xlu1 %1269 }
0x1501   :  { %1196 = vrot.lane.b32.xlu0 %v1194_v34, %s2151_s28  ;;  %v1272_v39 = vmul.f32 %v1998_v4, %v1270_v35 }
0x1503   :  { %1274 = vrot.lane.b32.xlu1 %v1272_v39, %s2151_s28 }
0x1573   :  { %v1197_v44 = vpop.permute.xlu0 %1196 }
0x1574   :  { %v2522_v45 = vadd.f32 %v1197_v44, %v1189_v41 }
0x1575   :  { %v1275_v47 = vpop.permute.xlu1 %1274 }
0x1576   :  { %1999 = vtanh.f32 %v2522_v45  ;;  %v2525_v48 = vadd.f32 %v1275_v47, %v1267_v46 }
0x1578   :  { %2001 = vtanh.f32 %v2525_v48  ;;  %v1423_v43 = vrot.slane %v2525_v48, 6 }
0x1580   :  { %v2000_v49 = vpop.eup %1999 }
0x1581   :  { %1202 = vrot.lane.b32.xlu0 %v2000_v49, %s2157_s0 }
0x1582   :  { %v2002_v50 = vpop.eup %2001 }
0x1583   :  { %1280 = vrot.lane.b32.xlu1 %v2002_v50, %s2157_s0  ;;  %v2031_v50 = vld [vmem:[%s2595_s3 + $0x1] ss:$0 sm:$0xff]  ;;  %s2162_s3 = smov 96  }
0x15f3   :  { %v1203_v52 = vpop.permute.xlu0 %1202 }
0x15f4   :  { %v1205_v53 = vmul.f32 %v1996_v32, %v1203_v52 }
0x15f5   :  { %v1281_v36 = vpop.permute.xlu1 %1280 }
0x15f6   :  { %v1206_v54 = vpack.c.bf16 %v1205_v53, %v1205_v53  ;;  %v1283_v55 = vmul.f32 %v1998_v4, %v1281_v36 }
0x15f8   :  { %v1289_v56 = vrot.slane %v1206_v54, 6  ;;  %v1284_v57 = vpack.c.bf16 %v1283_v55, %v1283_v55 }
0x15fa   :  { %1290 = vrot.lane.b32.xlu1 %v1289_v56, %s2157_s0  ;;  %1286 = vrot.lane.b32.xlu0 %v1284_v57, %s2151_s28  ;;  %v1365_v58 = vrot.slane %v1284_v57, 2 }
0x15fe   :  { %1366 = vrot.lane.b32.xlu0 %v1365_v58, %s2151_s28 }
0x166c   :  { %v1291_v59 = vpop.permute.xlu1 %1290  ;;  %v1287_v60 = vpop.permute.xlu0 %1286 }
0x166d   :  { %v1294_v61 = vsel %vm176_vm4, %v1287_v60, %v1291_v59 }
0x166e   :  { %v1296_v62 = vrot.slane %v1294_v61, 2 }
0x1670   :  { %v1367_v63 = vpop.permute.xlu0 %1366  ;;  %1848 = vmatmul.mubr.msk.bf16.vlgmr.msra.gmra.mrb[36].mxu1 %vm289_vm5, %v1296_v62 }
0x1671   :  { %1856 = vmatmul.mubr.msk.bf16.vlgmr.msra.gmra.mrb[24].mxu0 %vm176_vm4, %v1367_v63 }
0x1672   :  { %1860 = vmatpush3.bf16.msra.mxu0 %v2027_v1  ;;  %1867 = vmatprep.mubr.msk.bf16.mxu0 %vm2160_vm1, %v2159_v0 }
0x1673   :  { %1861 = vmatprep.subr.bf16.mxu0 %v2159_v0 }
0x1676   :  { %1862 = vmatpush3.bf16.msra.mxu0 %v2028_v2 }
0x1677   :  { %1863 = vmatprep.subr.bf16.mxu0 %v2159_v0 }
0x167a   :  { %1864 = vmatpush3.bf16.msra.mxu0 %v2029_v3 }
0x167b   :  { %1865 = vmatprep.subr.bf16.mxu0 %v2159_v0 }
0x167e   :  { %1866 = vmatpush3.bf16.msra.mxu0 %v2030_v5 }
0x1743   :  { %v1334_v6 = vpop.f32.mrb[36].mxu1 }
0x1744   :  { %v1335_v7 = vadd.f32 %v2305_v51, %v1334_v6  ;;  %v1849_v8 = vpop.f32.mrb[37].mxu1  ;;  %v1405_v11 = vpop.f32.mrb[24].mxu0 }
0x1745   :  { %v1412_v19 = vrot.slane %v1405_v11, 2  ;;  %v1337_v12 = vpop.f32.mrb[38].mxu1  ;;  %v1857_v13 = vpop.f32.mrb[25].mxu0 }
0x1746   :  { %2003 = vtanh.f32 %v1335_v7  ;;  %v1850_v14 = vpop.f32.mrb[39].mxu1  ;;  %v1408_v15 = vpop.f32.mrb[26].mxu0  ;;  %v1623_v18 = vmul.f32 -1.442695, %v1335_v7 }
0x1747   :  { %v1414_v16 = vadd.f32 %v1412_v19, %v2259_v17  ;;  %v1858_v9 = vpop.f32.mrb[27].mxu0 }
0x1749   :  { %2005 = vtanh.f32 %v1414_v16  ;;  %v1625_v51 = vmul.f32 -1.442695, %v1414_v16 }
0x174a   :  { %2007 = vpow2.f32 %v1623_v18 }
0x174b   :  { %2009 = vpow2.f32 %v1625_v51 }
0x1750   :  { %v2004_v37 = vpop.eup %2003 }
0x1751   :  { %1349 = vrot.lane.b32.xlu1 %v2004_v37, %s2157_s0 }
0x1753   :  { %v2006_v0 = vpop.eup %2005 }
0x1754   :  { %1427 = vrot.lane.b32.xlu0 %v2006_v0, %s2157_s0  ;;  %v2008_v20 = vpop.eup %2007 }
0x1755   :  { %v2010_v21 = vpop.eup %2009  ;;  %v1343_v22 = vadd.f32 1.0, %v2008_v20 }
0x1756   :  { %v1418_v38 = vadd.f32 1.0, %v2010_v21 }
0x1757   :  { %2011 = vrcp.f32 %v1343_v22 }
0x1758   :  { %2013 = vrcp.f32 %v1418_v38 }
0x1761   :  { %v2012_v23 = vpop.eup %2011 }
0x1762   :  { %v2014_v24 = vpop.eup %2013  ;;  %v1347_v26 = vmul.f32 %v2012_v23, %v2522_v45 }
0x1763   :  { %v1425_v29 = vmul.f32 %v2014_v24, %v1423_v43 }
0x17c3   :  { %v1350_v17 = vpop.permute.xlu1 %1349 }
0x17c4   :  { %v1352_v10 = vmul.f32 %v2012_v23, %v1350_v17 }
0x17c6   :  { %v1428_v25 = vpop.permute.xlu0 %1427  ;;  %1354 = vrot.lane.b32.xlu1 %v1352_v10, %s2151_s28 }
0x17c7   :  { %v1430_v40 = vmul.f32 %v2014_v24, %v1428_v25 }
0x17c9   :  { %1432 = vrot.lane.b32.xlu0 %v1430_v40, %s2151_s28 }
0x1838   :  { %v1355_v27 = vpop.permute.xlu1 %1354 }
0x1839   :  { %v1357_v28 = vadd.f32 %v1355_v27, %v1347_v26 }
0x183b   :  { %2015 = vtanh.f32 %v1357_v28  ;;  %v1433_v30 = vpop.permute.xlu0 %1432 }
0x183c   :  { %v1435_v31 = vadd.f32 %v1433_v30, %v1425_v29 }
0x183e   :  { %2017 = vtanh.f32 %v1435_v31 }
0x1845   :  { %v2016_v32 = vpop.eup %2015 }
0x1846   :  { %1360 = vrot.lane.b32.xlu1 %v2016_v32, %s2157_s0 }
0x1848   :  { %v2018_v33 = vpop.eup %2017 }
0x1849   :  { %1438 = vrot.lane.b32.xlu0 %v2018_v33, %s2157_s0 }
0x18b8   :  { %v1361_v34 = vpop.permute.xlu1 %1360 }
0x18b9   :  { %v1363_v4 = vmul.f32 %v2012_v23, %v1361_v34 }
0x18bb   :  { %v1364_v35 = vpack.c.bf16 %v1363_v4, %v1363_v4  ;;  %v1439_v39 = vpop.permute.xlu0 %1438 }
0x18bc   :  { %v1441_v41 = vmul.f32 %v2014_v24, %v1439_v39 }
0x18bd   :  { %v1447_v42 = vrot.slane %v1364_v35, 5 }
0x18be   :  { %v1442_v44 = vpack.c.bf16 %v1441_v41, %v1441_v41 }
0x18bf   :  { %1448 = vrot.lane.b32.xlu0 %v1447_v42, %s2157_s0 }
0x18c0   :  { %1444 = vrot.lane.b32.xlu1 %v1442_v44, %s2151_s28 }
0x1931   :  { %v1449_v45 = vpop.permute.xlu0 %1448 }
0x1932   :  { %v1445_v46 = vpop.permute.xlu1 %1444 }
0x1933   :  { %v1452_v47 = vsel %vm176_vm4, %v1445_v46, %v1449_v45 }
0x1934   :  { %v1454_v48 = vrot.slane %v1452_v47, 3 }
0x1936   :  { %1868 = vmatmul.mubr.msk.bf16.vlgmr.msra.gmra.mrb[28].mxu0 %vm289_vm5, %v1454_v48 }
0x1a09   :  { %v1492_v49 = vpop.f32.mrb[28].mxu0 }
0x1a0a   :  { %v1493_v52 = vadd.f32 %v2031_v50, %v1492_v49  ;;  %v1869_v53 = vpop.f32.mrb[29].mxu0 }
0x1a0b   :  { %v1495_v54 = vpop.f32.mrb[30].mxu0 }
0x1a0c   :  { %2019 = vtanh.f32 %v1493_v52  ;;  %v1870_v36 = vpop.f32.mrb[31].mxu0  ;;  %v1627_v56 = vmul.f32 -1.442695, %v1493_v52 }
0x1a0e   :  { %2021 = vpow2.f32 %v1627_v56 }
0x1a16   :  { %v2020_v55 = vpop.eup %2019 }
0x1a17   :  { %1507 = vrot.lane.b32.xlu1 %v2020_v55, %s2157_s0 }
0x1a18   :  { %v2022_v57 = vpop.eup %2021 }
0x1a19   :  { %v1501_v58 = vadd.f32 1.0, %v2022_v57 }
0x1a1b   :  { %2023 = vrcp.f32 %v1501_v58 }
0x1a25   :  { %v2024_v59 = vpop.eup %2023 }
0x1a26   :  { %v1505_v62 = vmul.f32 %v2024_v59, %v1357_v28 }
0x1a89   :  { %v1508_v60 = vpop.permute.xlu1 %1507 }
0x1a8a   :  { %v1510_v61 = vmul.f32 %v2024_v59, %v1508_v60 }
0x1a8c   :  { %1512 = vrot.lane.b32.xlu0 %v1510_v61, %s2151_s28 }
0x1a90   :  { %1523 = vrot.lane.b32.xlu0 %v1441_v41, %s2151_s28 }
0x1afe   :  { %v1513_v63 = vpop.permute.xlu0 %1512 }
0x1aff   :  { %v1515_v1 = vadd.f32 %v1513_v63, %v1505_v62 }
0x1b01   :  { %2025 = vtanh.f32 %v1515_v1 }
0x1b02   :  { %v1524_v2 = vpop.permute.xlu0 %1523 }
0x1b03   :  { %1527 = vst.msk [vmem:[#allocation9 - $0x6] sm:$0xc0] %vm1526_vm7, %v1524_v2 }
0x1b0b   :  { %v2026_v3 = vpop.eup %2025 }
0x1b0c   :  { %1518 = vrot.lane.b32.xlu1 %v2026_v3, %s2157_s0 }
0x1b10   :  { %1529 = vrot.lane.b32.xlu1 %v1435_v31, %s2162_s3 }
0x1b14   :  { %1542 = vrot.lane.b32.xlu1 %v1515_v1, %s2162_s3 }
0x1b15   :  { %2109 = shalt.err (!%p2106_p0)
}
0x1b16   :  { %s2110_s21 = scalar_lea.hbm %s2596_s4, 32 }
0x1b17   :  { %p2111_p1 = scmp.ne.s32.totalorder %s2596_s4, %s2110_s21  ;;  %p2114_p2 = scmp.lt.u32.totalorder %s2110_s21, %s2596_s4 }
0x1b19   :  { %p2116_p3 = pnand %p2114_p2, %p2111_p1 }
0x1b1b   :  { %2119 = shalt.err (!%p2116_p3)
}
0x1b1c   :  { %1556 = dma.vmem_to_hbm [thread:$0]  %s1554_s17, 32, %s2596_s4, [#allocation4]   ;;  %vm1539_vm8 = vcmask 254976  }
0x1b1d   :  { %s2164_s30 = smov [#allocation9]  }
0x1b1e   :  { %s1562_s6 = sshll.u32 %s2164_s30, 4  ;;  %s1563_s6 = int_to_ptr.vmem [resolvable:$true] %s1562_s6 }
0x1b1f   :  { %s2120_s0 = scalar_lea.vmem %s1563_s6, 128  ;;  %p2125_p5 = scmp.lt.s32.totalorder %s1563_s6, %s1563_s6 }
0x1b20   :  { %p2121_p4 = scmp.ne.s32.totalorder %s1563_s6, %s2120_s0  ;;  %p2126_p6 = scmp.lt.s32.totalorder %s2120_s0, %s2120_s0 }
0x1b22   :  { %p2127_p7 = por %p2126_p6, %p2125_p5 }
0x1b24   :  { %p2128_p8 = pnand %p2127_p7, %p2121_p4 }
0x1b7e   :  { %v1519_v5 = vpop.permute.xlu1 %1518 }
0x1b7f   :  { %v1521_v6 = vmul.f32 %v2024_v59, %v1519_v5 }
0x1b81   :  { %1535 = vrot.lane.b32.xlu0 %v1521_v6, %s2151_s28 }
0x1b82   :  { %v1530_v7 = vpop.permute.xlu1 %1529 }
0x1b83   :  { %1533 = vst.msk [vmem:[#allocation9 - $0x2] sm:$0xc0] %vm1526_vm7, %v1530_v7 }
0x1b86   :  { %v1543_v8 = vpop.permute.xlu1 %1542 }
0x1b87   :  { %1546 = vst.msk [vmem:[#allocation9 + $0x6] sm:$0x3] %vm1539_vm8, %v1543_v8 }
0x1bf3   :  { %v1536_v11 = vpop.permute.xlu0 %1535 }
0x1bf4   :  { %1540 = vst.msk [vmem:[#allocation9 + $0x2] sm:$0x3] %vm1539_vm8, %v1536_v11 }
0x1bf5   :  { %2131 = shalt.err (!%p2128_p8)
}
0x1bf6   :  { %s2132_s8 = scalar_lea.hbm %s2597_s5, 128 }
0x1bf7   :  { %p2133_p9 = scmp.ne.s32.totalorder %s2597_s5, %s2132_s8  ;;  %p2136_p10 = scmp.lt.u32.totalorder %s2132_s8, %s2597_s5 }
0x1bf9   :  { %p2138_p11 = pnand %p2136_p10, %p2133_p9 }
0x1bfb   :  { %2141 = shalt.err (!%p2138_p11)
}
0x1bfc   :  { %1568 = dma.vmem_to_hbm [thread:$0]  %s1563_s6, 128, %s2597_s5, [#allocation10], %s2151_s28, %s2151_s28, %s2152_s29  }
0x1bfd   :  { %2146 = dma.done.wait [#allocation4], 32  }
0x1bfe   :  { %2147 = vsyncadd [#allocation4], 4294967264 }
0x1bff   :  { %2148 = dma.done.wait [#allocation10], 128  }
0x1c00   :  { %2149 = vsyncadd [#allocation10], 4294967168 }
0x1c01   :  { %1575 = vsyncpa [#allocation3], 1 }
0x1c02   :  { %1576 = vsyncpa [#allocation6], 1 }
0x1c03   :  { %1577 = vsyncpa [#allocation4], 1 }
0x1c04   :  { %1578 = vsyncpa [#allocation10], 1 }

</bundles_post_ra>
